<compile_context>
chip_gen: v5e
topology: v5e:2x2
jax: 0.10.0
libtpu: 0.0.40
codegen_flags: <defaults>
</compile_context>

<pallas_src>
import functools

import jax
import jax.numpy as jnp
from jax import lax
from jax.experimental import pallas as pl
from jax.experimental.pallas import tpu as pltpu


def gat_heads_kernel(h_all_ref, h_dst_ref, w_ref, adj_ref, out_ref, *,
                     num_heads, d_out, matmul_dtype):
    """All attention heads for one destination-node tile.

    h_all_ref: (N, D_in)        all node features (resident every step)
    h_dst_ref: (T, D_in)        features of this tile's destination nodes
    w_ref:     (D_in, H*D_out)  all head fc weights, pre-transposed
    adj_ref:   (T, N) int8      adjacency, row = dst, col = src (1 iff edge src->dst)
    out_ref:   (T, H*D_out)     concatenated head outputs for this dst tile
    """
    h_all = h_all_ref[...].astype(matmul_dtype)          # (N, D_in)
    h_dst = h_dst_ref[...].astype(matmul_dtype)          # (T, D_in)
    w_all = w_ref[...].astype(matmul_dtype)              # (D_in, H*D_out)

    # Recompute the (small) linear layer per tile: O(N*D_in*H*D_out) vs the
    # O(T*N*D_out) attention work.  Keeps the dst-tile grid axis megacore-safe.
    z_src = jnp.dot(h_all, w_all, preferred_element_type=jnp.float32)   # (N, HD)
    z_dst = jnp.dot(h_dst, w_all, preferred_element_type=jnp.float32)   # (T, HD)

    edge_mask = adj_ref[...] != 0                        # (T, N) bool, hoisted
    neg_inf = jnp.float32(-1e30)

    for hd in range(num_heads):
        sl = slice(hd * d_out, (hd + 1) * d_out)
        # NOTE: 16-lane slices of the 64-lane z slab may relayout; acceptable at
        # H*D_out=64 -- switch to an (H, N, D_out) batched layout if it shows up
        # in the bundle dump.
        zs = z_src[:, sl].astype(matmul_dtype)           # (N, D_out)
        zd = z_dst[:, sl].astype(matmul_dtype)           # (T, D_out)

        # scores s[v, u] = <z[v], z[u]>; contract the feature dim of both
        # operands directly (MXU-native, no explicit transpose).
        s = lax.dot_general(zd, zs, (((1,), (1,)), ((), ())),
                            preferred_element_type=jnp.float32)          # (T, N)
        e = jnp.maximum(s, 0.2 * s)                      # leaky_relu(0.2)

        # softmax over incoming edges (src axis = last axis).
        masked = jnp.where(edge_mask, e, neg_inf)
        m = jnp.max(masked, axis=-1, keepdims=True)
        p = jnp.exp(masked - m)                          # exact 0 on non-edges
        denom = jnp.sum(p, axis=-1, keepdims=True)       # >= 1 (argmax term is 1)

        # Fold the softmax normalization after the aggregation matmul.
        ho = jnp.dot(p.astype(matmul_dtype), zs,
                     preferred_element_type=jnp.float32)                 # (T, D_out)
        ho = ho * pl.reciprocal(denom, approx=True)

        # elu (exp only on the non-positive branch), stored per head.
        out_ref[:, sl] = jnp.where(
            ho > 0, ho, jnp.exp(jnp.minimum(ho, 0.0)) - 1.0
        ).astype(out_ref.dtype)


def _pick_tile_dst(n):
    """Small graphs: single full-N tile (no extra grid steps).  Larger graphs:
    a 32-multiple dst tile so the int8 adjacency block stays layout-friendly."""
    if n <= 256:
        return n
    for t in (512, 256, 128, 64, 32):
        if n % t == 0:
            return t
    return n  # fallback: full-N tile (gridless)


def multi_head_gat(h, weights, adj, merge="cat", *, tile_dst=None,
                   matmul_dtype=jnp.bfloat16):
    """h: (N, D_in) f32; weights: (H, D_out, D_in) f32 (PyTorch Linear layout);
    adj: (N, N) with adj[u, v] != 0 iff edge u -> v."""
    N, D_in = h.shape
    H, D_out, _ = weights.shape
    HD = H * D_out

    # Host-side plumbing (free, one-time):
    #  * weights -> (D_in, H*D_out): one fused linear, no in-kernel w.T
    #  * adjacency -> dst-major int8: softmax along the last (lane) axis,
    #    4x less HBM traffic / VMEM than a pre-expanded f32 bias.
    w_all = jnp.transpose(weights, (2, 0, 1)).reshape(D_in, HD).astype(jnp.float32)
    adj_dst = (adj.T > 0).astype(jnp.int8)

    if tile_dst is None:
        tile_dst = _pick_tile_dst(N)
    assert N % tile_dst == 0, "dst tile must divide N"
    grid = (N // tile_dst,)

    kernel = functools.partial(gat_heads_kernel, num_heads=H, d_out=D_out,
                               matmul_dtype=matmul_dtype)

    out = pl.pallas_call(
        kernel,
        out_shape=jax.ShapeDtypeStruct((N, HD), jnp.float32),
        grid=grid,
        in_specs=[
            pl.BlockSpec((N, D_in), lambda i: (0, 0)),        # h (all src nodes)
            pl.BlockSpec((tile_dst, D_in), lambda i: (i, 0)), # h (dst tile)
            pl.BlockSpec((D_in, HD), lambda i: (0, 0)),       # fused weights
            pl.BlockSpec((tile_dst, N), lambda i: (i, 0)),    # int8 adjacency rows
        ],
        out_specs=pl.BlockSpec((tile_dst, HD), lambda i: (i, 0)),
        compiler_params=pltpu.CompilerParams(
            dimension_semantics=("parallel",),        # shard dst tiles on v7x megacore
            vmem_limit_bytes=32 * 1024 * 1024,
        ),
    )(h, h, w_all, adj_dst)

    if merge == "cat":
        return out                                    # already (N, H*D_out)
    # torch.mean(torch.stack(head_outs), dim=0)
    return jnp.mean(out.reshape(N, H, D_out), axis=1)


def _reference(h, weights, adj, merge="cat", matmul_dtype=jnp.bfloat16):
    """Pure-JAX reference mirroring the kernel's matmul dtype (f32 accumulation)."""
    hN = h.shape[0]
    hm = h.astype(matmul_dtype)
    adj_dst = adj.T > 0
    outs = []
    for w in weights:
        z = jnp.dot(hm, w.T.astype(matmul_dtype),
                    preferred_element_type=jnp.float32)
        zc = z.astype(matmul_dtype)
        s = jnp.dot(zc, zc.T, preferred_element_type=jnp.float32)
        e = jnp.maximum(s, 0.2 * s)
        masked = jnp.where(adj_dst, e, jnp.float32(-1e30))
        m = jnp.max(masked, axis=-1, keepdims=True)
        p = jnp.exp(masked - m)
        denom = jnp.sum(p, axis=-1, keepdims=True)
        ho = jnp.dot(p.astype(matmul_dtype), zc,
                     preferred_element_type=jnp.float32) / denom
        outs.append(jnp.where(ho > 0, ho, jnp.exp(jnp.minimum(ho, 0.0)) - 1.0))
    if merge == "cat":
        return jnp.concatenate(outs, axis=1)
    return jnp.mean(jnp.stack(outs), axis=0)


if __name__ == "__main__":
    # Small synthetic problem (matches the module's intended shapes).
    N, D_in, D_out, H = 64, 32, 16, 4

    key = jax.random.PRNGKey(0)
    k_h, k_w, k_a, k_h2, k_a2 = jax.random.split(key, 5)

    h = jax.random.normal(k_h, (N, D_in), dtype=jnp.float32)
    std = (2.0 / (D_in + D_out)) ** 0.5                 # xavier-normal-ish
    weights = std * jax.random.normal(k_w, (H, D_out, D_in), dtype=jnp.float32)
    adj = (jax.random.uniform(k_a, (N, N)) < 0.15).astype(jnp.float32)
    adj = jnp.maximum(adj, jnp.eye(N, dtype=jnp.float32))   # self-loops: >=1 in-edge

    # 1) Default bf16 fast path (single-tile grid at this N), 'cat' merge.
    out = jax.block_until_ready(multi_head_gat(h, weights, adj, merge="cat"))
    ref = _reference(h, weights, adj, merge="cat", matmul_dtype=jnp.bfloat16)
    assert out.shape == (N, H * D_out)
    assert jnp.allclose(out, ref, atol=2e-2, rtol=2e-2)

    # 2) Exact-semantics check: f32 matmuls vs f32 reference.
    out32 = jax.block_until_ready(
        multi_head_gat(h, weights, adj, merge="cat", matmul_dtype=jnp.float32))
    ref32 = _reference(h, weights, adj, merge="cat", matmul_dtype=jnp.float32)
    assert jnp.allclose(out32, ref32, atol=1e-2, rtol=1e-2)

    # 3) 'mean' merge path.
    out_mean = jax.block_until_ready(multi_head_gat(h, weights, adj, merge="mean"))
    ref_mean = _reference(h, weights, adj, merge="mean", matmul_dtype=jnp.bfloat16)
    assert out_mean.shape == (N, D_out)
    assert jnp.allclose(out_mean, ref_mean, atol=2e-2, rtol=2e-2)

    # 4) Multi-tile grid path (dst axis tiled -> pipelined adjacency DMA + megacore).
    N2 = 256
    h2 = jax.random.normal(k_h2, (N2, D_in), dtype=jnp.float32)
    adj2 = (jax.random.uniform(k_a2, (N2, N2)) < 0.05).astype(jnp.float32)
    adj2 = jnp.maximum(adj2, jnp.eye(N2, dtype=jnp.float32))
    out2 = jax.block_until_ready(
        multi_head_gat(h2, weights, adj2, merge="cat", tile_dst=128))
    ref2 = _reference(h2, weights, adj2, merge="cat", matmul_dtype=jnp.bfloat16)
    assert out2.shape == (N2, H * D_out)
    assert jnp.allclose(out2, ref2, atol=2e-2, rtol=2e-2)

    print("KERNEL_OK")
</pallas_src>

<mosaic_0001>
module attributes {stable_mosaic.version = 11 : i64} {
  func.func @gat_heads_kernel(%arg0: i32, %arg1: memref<64x32xf32, #tpu.memory_space<vmem>>, %arg2: memref<64x32xf32, #tpu.memory_space<vmem>>, %arg3: memref<32x64xf32, #tpu.memory_space<vmem>>, %arg4: memref<64x64xi8, #tpu.memory_space<vmem>>, %arg5: memref<64x64xf32, #tpu.memory_space<vmem>>) attributes {dimension_semantics = [#tpu.dimension_semantics<parallel>], iteration_bounds = array<i64: 1>, scalar_prefetch = 0 : i64, scratch_operands = 0 : i64, tpu.core_type = #tpu.core_type<tc>, window_params = [{pipeline_mode = #tpu.pipeline_mode<synchronous>, transform_indices = @transform_0, window_bounds = array<i64: 64, 32>}, {transform_indices = @transform_1, window_bounds = array<i64: 64, 32>}, {pipeline_mode = #tpu.pipeline_mode<synchronous>, transform_indices = @transform_2, window_bounds = array<i64: 32, 64>}, {transform_indices = @transform_3, window_bounds = array<i64: 64, 64>}, {transform_indices = @transform_4, window_bounds = array<i64: 64, 64>}]} {
    %c0 = arith.constant 0 : index
    %c0_0 = arith.constant 0 : index
    %0 = vector.load %arg1[%c0, %c0_0] : memref<64x32xf32, #tpu.memory_space<vmem>>, vector<64x32xf32>
    %1 = arith.truncf %0 : vector<64x32xf32> to vector<64x32xbf16>
    %c0_1 = arith.constant 0 : index
    %c0_2 = arith.constant 0 : index
    %2 = vector.load %arg2[%c0_1, %c0_2] : memref<64x32xf32, #tpu.memory_space<vmem>>, vector<64x32xf32>
    %3 = arith.truncf %2 : vector<64x32xf32> to vector<64x32xbf16>
    %c0_3 = arith.constant 0 : index
    %c0_4 = arith.constant 0 : index
    %4 = vector.load %arg3[%c0_3, %c0_4] : memref<32x64xf32, #tpu.memory_space<vmem>>, vector<32x64xf32>
    %5 = arith.truncf %4 : vector<32x64xf32> to vector<32x64xbf16>
    %cst = arith.constant dense<0.000000e+00> : vector<64x64xf32>
    %6 = tpu.matmul %1, %5, %cst {dimension_numbers = #tpu.dot_dimension_numbers<[1], [0], [0], [1], [0, 0, 1, 1], [], []>} : vector<64x32xbf16>, vector<32x64xbf16>, vector<64x64xf32> -> vector<64x64xf32>
    %cst_5 = arith.constant dense<0.000000e+00> : vector<64x64xf32>
    %7 = tpu.matmul %3, %5, %cst_5 {dimension_numbers = #tpu.dot_dimension_numbers<[1], [0], [0], [1], [0, 0, 1, 1], [], []>} : vector<64x32xbf16>, vector<32x64xbf16>, vector<64x64xf32> -> vector<64x64xf32>
    %c0_6 = arith.constant 0 : index
    %c0_7 = arith.constant 0 : index
    %8 = vector.load %arg4[%c0_6, %c0_7] : memref<64x64xi8, #tpu.memory_space<vmem>>, vector<64x64xi8>
    %c0_i8 = arith.constant 0 : i8
    %9 = vector.broadcast %c0_i8 : i8 to vector<64x64xi8>
    %10 = arith.cmpi ne, %8, %9 : vector<64x64xi8>
    %11 = vector.extract_strided_slice %6 {offsets = [0, 0], sizes = [64, 16], strides = [1, 1]} : vector<64x64xf32> to vector<64x16xf32>
    %12 = arith.truncf %11 : vector<64x16xf32> to vector<64x16xbf16>
    %13 = vector.extract_strided_slice %7 {offsets = [0, 0], sizes = [64, 16], strides = [1, 1]} : vector<64x64xf32> to vector<64x16xf32>
    %14 = arith.truncf %13 : vector<64x16xf32> to vector<64x16xbf16>
    %cst_8 = arith.constant dense<0.000000e+00> : vector<64x64xf32>
    %15 = tpu.matmul %14, %12, %cst_8 {dimension_numbers = #tpu.dot_dimension_numbers<[1], [1], [0], [0], [0, 0, 1, 0], [], []>} : vector<64x16xbf16>, vector<64x16xbf16>, vector<64x64xf32> -> vector<64x64xf32>
    %cst_9 = arith.constant 2.000000e-01 : f32
    %16 = vector.broadcast %cst_9 : f32 to vector<64x64xf32>
    %17 = arith.mulf %16, %15 : vector<64x64xf32>
    %18 = arith.maximumf %15, %17 : vector<64x64xf32>
    %cst_10 = arith.constant -1.000000e+30 : f32
    %19 = vector.broadcast %cst_10 : f32 to vector<64x64xf32>
    %20 = arith.select %10, %18, %19 : vector<64x64xi1>, vector<64x64xf32>
    %cst_11 = arith.constant dense<0xFF800000> : vector<64xf32>
    %21 = vector.multi_reduction <maximumf>, %20, %cst_11 [1] : vector<64x64xf32> to vector<64xf32>
    %22 = vector.shape_cast %21 : vector<64xf32> to vector<64x1xf32>
    %23 = vector.broadcast %22 : vector<64x1xf32> to vector<64x64xf32>
    %24 = arith.subf %20, %23 : vector<64x64xf32>
    %25 = math.exp %24 : vector<64x64xf32>
    %cst_12 = arith.constant dense<0.000000e+00> : vector<64xf32>
    %26 = vector.multi_reduction <add>, %25, %cst_12 [1] : vector<64x64xf32> to vector<64xf32>
    %27 = vector.shape_cast %26 : vector<64xf32> to vector<64x1xf32>
    %28 = arith.truncf %25 : vector<64x64xf32> to vector<64x64xbf16>
    %cst_13 = arith.constant dense<0.000000e+00> : vector<64x16xf32>
    %29 = tpu.matmul %28, %12, %cst_13 {dimension_numbers = #tpu.dot_dimension_numbers<[1], [0], [0], [1], [0, 0, 1, 1], [], []>} : vector<64x64xbf16>, vector<64x16xbf16>, vector<64x16xf32> -> vector<64x16xf32>
    %30 = tpu.reciprocal %27 {approx = true} : vector<64x1xf32> -> vector<64x1xf32>
    %31 = vector.broadcast %30 : vector<64x1xf32> to vector<64x16xf32>
    %32 = arith.mulf %29, %31 : vector<64x16xf32>
    %cst_14 = arith.constant 0.000000e+00 : f32
    %33 = vector.broadcast %cst_14 : f32 to vector<64x16xf32>
    %34 = arith.cmpf ogt, %32, %33 : vector<64x16xf32>
    %cst_15 = arith.constant 0.000000e+00 : f32
    %35 = vector.broadcast %cst_15 : f32 to vector<64x16xf32>
    %36 = arith.minimumf %32, %35 : vector<64x16xf32>
    %37 = math.exp %36 : vector<64x16xf32>
    %cst_16 = arith.constant 1.000000e+00 : f32
    %38 = vector.broadcast %cst_16 : f32 to vector<64x16xf32>
    %39 = arith.subf %37, %38 : vector<64x16xf32>
    %40 = arith.select %34, %32, %39 : vector<64x16xi1>, vector<64x16xf32>
    %c0_17 = arith.constant 0 : index
    %c0_18 = arith.constant 0 : index
    %41 = vector.load %arg5[%c0_17, %c0_18] : memref<64x64xf32, #tpu.memory_space<vmem>>, vector<64x16xf32>
    tpu.vector_store %arg5[%c0_17, %c0_18], %40 {strides = array<i32>} : memref<64x64xf32, #tpu.memory_space<vmem>>, vector<64x16xf32>,
    %42 = vector.extract_strided_slice %6 {offsets = [0, 16], sizes = [64, 16], strides = [1, 1]} : vector<64x64xf32> to vector<64x16xf32>
    %43 = arith.truncf %42 : vector<64x16xf32> to vector<64x16xbf16>
    %44 = vector.extract_strided_slice %7 {offsets = [0, 16], sizes = [64, 16], strides = [1, 1]} : vector<64x64xf32> to vector<64x16xf32>
    %45 = arith.truncf %44 : vector<64x16xf32> to vector<64x16xbf16>
    %cst_19 = arith.constant dense<0.000000e+00> : vector<64x64xf32>
    %46 = tpu.matmul %45, %43, %cst_19 {dimension_numbers = #tpu.dot_dimension_numbers<[1], [1], [0], [0], [0, 0, 1, 0], [], []>} : vector<64x16xbf16>, vector<64x16xbf16>, vector<64x64xf32> -> vector<64x64xf32>
    %cst_20 = arith.constant 2.000000e-01 : f32
    %47 = vector.broadcast %cst_20 : f32 to vector<64x64xf32>
    %48 = arith.mulf %47, %46 : vector<64x64xf32>
    %49 = arith.maximumf %46, %48 : vector<64x64xf32>
    %cst_21 = arith.constant -1.000000e+30 : f32
    %50 = vector.broadcast %cst_21 : f32 to vector<64x64xf32>
    %51 = arith.select %10, %49, %50 : vector<64x64xi1>, vector<64x64xf32>
    %cst_22 = arith.constant dense<0xFF800000> : vector<64xf32>
    %52 = vector.multi_reduction <maximumf>, %51, %cst_22 [1] : vector<64x64xf32> to vector<64xf32>
    %53 = vector.shape_cast %52 : vector<64xf32> to vector<64x1xf32>
    %54 = vector.broadcast %53 : vector<64x1xf32> to vector<64x64xf32>
    %55 = arith.subf %51, %54 : vector<64x64xf32>
    %56 = math.exp %55 : vector<64x64xf32>
    %cst_23 = arith.constant dense<0.000000e+00> : vector<64xf32>
    %57 = vector.multi_reduction <add>, %56, %cst_23 [1] : vector<64x64xf32> to vector<64xf32>
    %58 = vector.shape_cast %57 : vector<64xf32> to vector<64x1xf32>
    %59 = arith.truncf %56 : vector<64x64xf32> to vector<64x64xbf16>
    %cst_24 = arith.constant dense<0.000000e+00> : vector<64x16xf32>
    %60 = tpu.matmul %59, %43, %cst_24 {dimension_numbers = #tpu.dot_dimension_numbers<[1], [0], [0], [1], [0, 0, 1, 1], [], []>} : vector<64x64xbf16>, vector<64x16xbf16>, vector<64x16xf32> -> vector<64x16xf32>
    %61 = tpu.reciprocal %58 {approx = true} : vector<64x1xf32> -> vector<64x1xf32>
    %62 = vector.broadcast %61 : vector<64x1xf32> to vector<64x16xf32>
    %63 = arith.mulf %60, %62 : vector<64x16xf32>
    %cst_25 = arith.constant 0.000000e+00 : f32
    %64 = vector.broadcast %cst_25 : f32 to vector<64x16xf32>
    %65 = arith.cmpf ogt, %63, %64 : vector<64x16xf32>
    %cst_26 = arith.constant 0.000000e+00 : f32
    %66 = vector.broadcast %cst_26 : f32 to vector<64x16xf32>
    %67 = arith.minimumf %63, %66 : vector<64x16xf32>
    %68 = math.exp %67 : vector<64x16xf32>
    %cst_27 = arith.constant 1.000000e+00 : f32
    %69 = vector.broadcast %cst_27 : f32 to vector<64x16xf32>
    %70 = arith.subf %68, %69 : vector<64x16xf32>
    %71 = arith.select %65, %63, %70 : vector<64x16xi1>, vector<64x16xf32>
    %c0_28 = arith.constant 0 : index
    %c16 = arith.constant 16 : index
    %72 = vector.load %arg5[%c0_28, %c16] : memref<64x64xf32, #tpu.memory_space<vmem>>, vector<64x16xf32>
    tpu.vector_store %arg5[%c0_28, %c16], %71 {strides = array<i32>} : memref<64x64xf32, #tpu.memory_space<vmem>>, vector<64x16xf32>,
    %73 = vector.extract_strided_slice %6 {offsets = [0, 32], sizes = [64, 16], strides = [1, 1]} : vector<64x64xf32> to vector<64x16xf32>
    %74 = arith.truncf %73 : vector<64x16xf32> to vector<64x16xbf16>
    %75 = vector.extract_strided_slice %7 {offsets = [0, 32], sizes = [64, 16], strides = [1, 1]} : vector<64x64xf32> to vector<64x16xf32>
    %76 = arith.truncf %75 : vector<64x16xf32> to vector<64x16xbf16>
    %cst_29 = arith.constant dense<0.000000e+00> : vector<64x64xf32>
    %77 = tpu.matmul %76, %74, %cst_29 {dimension_numbers = #tpu.dot_dimension_numbers<[1], [1], [0], [0], [0, 0, 1, 0], [], []>} : vector<64x16xbf16>, vector<64x16xbf16>, vector<64x64xf32> -> vector<64x64xf32>
    %cst_30 = arith.constant 2.000000e-01 : f32
    %78 = vector.broadcast %cst_30 : f32 to vector<64x64xf32>
    %79 = arith.mulf %78, %77 : vector<64x64xf32>
    %80 = arith.maximumf %77, %79 : vector<64x64xf32>
    %cst_31 = arith.constant -1.000000e+30 : f32
    %81 = vector.broadcast %cst_31 : f32 to vector<64x64xf32>
    %82 = arith.select %10, %80, %81 : vector<64x64xi1>, vector<64x64xf32>
    %cst_32 = arith.constant dense<0xFF800000> : vector<64xf32>
    %83 = vector.multi_reduction <maximumf>, %82, %cst_32 [1] : vector<64x64xf32> to vector<64xf32>
    %84 = vector.shape_cast %83 : vector<64xf32> to vector<64x1xf32>
    %85 = vector.broadcast %84 : vector<64x1xf32> to vector<64x64xf32>
    %86 = arith.subf %82, %85 : vector<64x64xf32>
    %87 = math.exp %86 : vector<64x64xf32>
    %cst_33 = arith.constant dense<0.000000e+00> : vector<64xf32>
    %88 = vector.multi_reduction <add>, %87, %cst_33 [1] : vector<64x64xf32> to vector<64xf32>
    %89 = vector.shape_cast %88 : vector<64xf32> to vector<64x1xf32>
    %90 = arith.truncf %87 : vector<64x64xf32> to vector<64x64xbf16>
    %cst_34 = arith.constant dense<0.000000e+00> : vector<64x16xf32>
    %91 = tpu.matmul %90, %74, %cst_34 {dimension_numbers = #tpu.dot_dimension_numbers<[1], [0], [0], [1], [0, 0, 1, 1], [], []>} : vector<64x64xbf16>, vector<64x16xbf16>, vector<64x16xf32> -> vector<64x16xf32>
    %92 = tpu.reciprocal %89 {approx = true} : vector<64x1xf32> -> vector<64x1xf32>
    %93 = vector.broadcast %92 : vector<64x1xf32> to vector<64x16xf32>
    %94 = arith.mulf %91, %93 : vector<64x16xf32>
    %cst_35 = arith.constant 0.000000e+00 : f32
    %95 = vector.broadcast %cst_35 : f32 to vector<64x16xf32>
    %96 = arith.cmpf ogt, %94, %95 : vector<64x16xf32>
    %cst_36 = arith.constant 0.000000e+00 : f32
    %97 = vector.broadcast %cst_36 : f32 to vector<64x16xf32>
    %98 = arith.minimumf %94, %97 : vector<64x16xf32>
    %99 = math.exp %98 : vector<64x16xf32>
    %cst_37 = arith.constant 1.000000e+00 : f32
    %100 = vector.broadcast %cst_37 : f32 to vector<64x16xf32>
    %101 = arith.subf %99, %100 : vector<64x16xf32>
    %102 = arith.select %96, %94, %101 : vector<64x16xi1>, vector<64x16xf32>
    %c0_38 = arith.constant 0 : index
    %c32 = arith.constant 32 : index
    %103 = vector.load %arg5[%c0_38, %c32] : memref<64x64xf32, #tpu.memory_space<vmem>>, vector<64x16xf32>
    tpu.vector_store %arg5[%c0_38, %c32], %102 {strides = array<i32>} : memref<64x64xf32, #tpu.memory_space<vmem>>, vector<64x16xf32>,
    %104 = vector.extract_strided_slice %6 {offsets = [0, 48], sizes = [64, 16], strides = [1, 1]} : vector<64x64xf32> to vector<64x16xf32>
    %105 = arith.truncf %104 : vector<64x16xf32> to vector<64x16xbf16>
    %106 = vector.extract_strided_slice %7 {offsets = [0, 48], sizes = [64, 16], strides = [1, 1]} : vector<64x64xf32> to vector<64x16xf32>
    %107 = arith.truncf %106 : vector<64x16xf32> to vector<64x16xbf16>
    %cst_39 = arith.constant dense<0.000000e+00> : vector<64x64xf32>
    %108 = tpu.matmul %107, %105, %cst_39 {dimension_numbers = #tpu.dot_dimension_numbers<[1], [1], [0], [0], [0, 0, 1, 0], [], []>} : vector<64x16xbf16>, vector<64x16xbf16>, vector<64x64xf32> -> vector<64x64xf32>
    %cst_40 = arith.constant 2.000000e-01 : f32
    %109 = vector.broadcast %cst_40 : f32 to vector<64x64xf32>
    %110 = arith.mulf %109, %108 : vector<64x64xf32>
    %111 = arith.maximumf %108, %110 : vector<64x64xf32>
    %cst_41 = arith.constant -1.000000e+30 : f32
    %112 = vector.broadcast %cst_41 : f32 to vector<64x64xf32>
    %113 = arith.select %10, %111, %112 : vector<64x64xi1>, vector<64x64xf32>
    %cst_42 = arith.constant dense<0xFF800000> : vector<64xf32>
    %114 = vector.multi_reduction <maximumf>, %113, %cst_42 [1] : vector<64x64xf32> to vector<64xf32>
    %115 = vector.shape_cast %114 : vector<64xf32> to vector<64x1xf32>
    %116 = vector.broadcast %115 : vector<64x1xf32> to vector<64x64xf32>
    %117 = arith.subf %113, %116 : vector<64x64xf32>
    %118 = math.exp %117 : vector<64x64xf32>
    %cst_43 = arith.constant dense<0.000000e+00> : vector<64xf32>
    %119 = vector.multi_reduction <add>, %118, %cst_43 [1] : vector<64x64xf32> to vector<64xf32>
    %120 = vector.shape_cast %119 : vector<64xf32> to vector<64x1xf32>
    %121 = arith.truncf %118 : vector<64x64xf32> to vector<64x64xbf16>
    %cst_44 = arith.constant dense<0.000000e+00> : vector<64x16xf32>
    %122 = tpu.matmul %121, %105, %cst_44 {dimension_numbers = #tpu.dot_dimension_numbers<[1], [0], [0], [1], [0, 0, 1, 1], [], []>} : vector<64x64xbf16>, vector<64x16xbf16>, vector<64x16xf32> -> vector<64x16xf32>
    %123 = tpu.reciprocal %120 {approx = true} : vector<64x1xf32> -> vector<64x1xf32>
    %124 = vector.broadcast %123 : vector<64x1xf32> to vector<64x16xf32>
    %125 = arith.mulf %122, %124 : vector<64x16xf32>
    %cst_45 = arith.constant 0.000000e+00 : f32
    %126 = vector.broadcast %cst_45 : f32 to vector<64x16xf32>
    %127 = arith.cmpf ogt, %125, %126 : vector<64x16xf32>
    %cst_46 = arith.constant 0.000000e+00 : f32
    %128 = vector.broadcast %cst_46 : f32 to vector<64x16xf32>
    %129 = arith.minimumf %125, %128 : vector<64x16xf32>
    %130 = math.exp %129 : vector<64x16xf32>
    %cst_47 = arith.constant 1.000000e+00 : f32
    %131 = vector.broadcast %cst_47 : f32 to vector<64x16xf32>
    %132 = arith.subf %130, %131 : vector<64x16xf32>
    %133 = arith.select %127, %125, %132 : vector<64x16xi1>, vector<64x16xf32>
    %c0_48 = arith.constant 0 : index
    %c48 = arith.constant 48 : index
    %134 = vector.load %arg5[%c0_48, %c48] : memref<64x64xf32, #tpu.memory_space<vmem>>, vector<64x16xf32>
    tpu.vector_store %arg5[%c0_48, %c48], %133 {strides = array<i32>} : memref<64x64xf32, #tpu.memory_space<vmem>>, vector<64x16xf32>,
    return
  }
  func.func @transform_0(%arg0: i32) -> (i32, i32) {
    %c0_i32 = arith.constant 0 : i32
    %c0_i32_0 = arith.constant 0 : i32
    %c0_i32_1 = arith.constant 0 : i32
    return %c0_i32, %c0_i32_0 : i32, i32
  }
  func.func @transform_1(%arg0: i32) -> (i32, i32) {
    %c0_i32 = arith.constant 0 : i32
    %c0_i32_0 = arith.constant 0 : i32
    return %arg0, %c0_i32 : i32, i32
  }
  func.func @transform_2(%arg0: i32) -> (i32, i32) {
    %c0_i32 = arith.constant 0 : i32
    %c0_i32_0 = arith.constant 0 : i32
    %c0_i32_1 = arith.constant 0 : i32
    return %c0_i32, %c0_i32_0 : i32, i32
  }
  func.func @transform_3(%arg0: i32) -> (i32, i32) {
    %c0_i32 = arith.constant 0 : i32
    %c0_i32_0 = arith.constant 0 : i32
    return %arg0, %c0_i32 : i32, i32
  }
  func.func @transform_4(%arg0: i32) -> (i32, i32) {
    %c0_i32 = arith.constant 0 : i32
    %c0_i32_0 = arith.constant 0 : i32
    return %arg0, %c0_i32 : i32, i32
  }
}

</mosaic_0001>

<bundles_post_ra>
// kernel: tpu_custom_call.1
= control target key start
LH: loop header
LB: loop body
LE: loop exit
PB: predicated region body
PF: predicated region fallthrough
CT: control target
= control target key end

     0   :  { %s2515_s0 = inlined_call_operand.vmem [shape: f32[64,32], index: 0, kind: input, shape index: {}]   ;;  %s2516_s1 = inlined_call_operand.vmem [shape: f32[64,32], index: 1, kind: input, shape index: {}]   ;;  %s2517_s2 = inlined_call_operand.vmem [shape: f32[32,64], index: 2, kind: input, shape index: {}]   ;;  %s2518_s3 = inlined_call_operand.vmem [shape: s8[64,64], index: 3, kind: input, shape index: {}]   ;;  %s2519_s4 = inlined_call_operand.hbm [shape: f32[64,64], index: 4, kind: output, shape index: {}]  }
   0x1   :  { %v47_v0 = vld [vmem:[%s2517_s2 + $0x10] sm:$0xff]  ;;  %v48_v1 = vld [vmem:[%s2517_s2 + $0x18] sm:$0xff]  ;;  %v45_v2 = vld [vmem:[%s2517_s2] sm:$0xff] }
   0x2   :  { %v50_v3 = vpack.c.bf16 %v48_v1, %v47_v0  ;;  %v46_v4 = vld [vmem:[%s2517_s2 + $0x8] sm:$0xff]  ;;  %v25_v5 = vld [vmem:[%s2515_s0 + $0x20] sm:$0xff] }
   0x3   :  { %v49_v6 = vpack.c.bf16 %v46_v4, %v45_v2  ;;  %v26_v7 = vld [vmem:[%s2515_s0 + $0x28] sm:$0xff]  ;;  %v21_v8 = vld [vmem:[%s2515_s0] sm:$0xff] }
   0x4   :  { %1527 = vmatpush.bf16.msra.mxu3 %v50_v3  ;;  %70 = vmatpush.bf16.msra.mxu0 %v50_v3  ;;  %v22_v9 = vld [vmem:[%s2515_s0 + $0x8] sm:$0xff]  ;;  %v33_v10 = vld [vmem:[%s2516_s1] sm:$0xff]  ;;  %v31_v14 = vpack.c.bf16 %v26_v7, %v25_v5 }
   0x5   :  { %111 = vmatpush.bf16.msra.mxu1 %v50_v3  ;;  %v34_v11 = vld [vmem:[%s2516_s1 + $0x8] sm:$0xff]  ;;  %1529 = vmatpush.bf16.msra.mxu2 %v50_v3  ;;  %v37_v12 = vld [vmem:[%s2516_s1 + $0x20] sm:$0xff]  ;;  %v29_v15 = vpack.c.bf16 %v22_v9, %v21_v8 }
   0x6   :  { %v38_v13 = vld [vmem:[%s2516_s1 + $0x28] sm:$0xff] }
   0x7   :  { %9 = vsyncpa [#allocation3], 0  ;;  %vm51_vm0 = vcmask 261120   ;;  %v41_v16 = vpack.c.bf16 %v34_v11, %v33_v10  ;;  %v43_v17 = vpack.c.bf16 %v38_v13, %v37_v12  ;;  %v27_v18 = vld [vmem:[%s2515_s0 + $0x30] sm:$0xff]  ;;  %v28_v19 = vld [vmem:[%s2515_s0 + $0x38] sm:$0xff]  ;;  %s1759_s27 = smov 112  }
   0x8   :  { %1528 = vmatpush.bf16.msra.mxu3 %v49_v6  ;;  %71 = vmatpush.bf16.msra.mxu0 %v49_v6  ;;  %v23_v20 = vld [vmem:[%s2515_s0 + $0x10] sm:$0xff]  ;;  %v24_v21 = vld [vmem:[%s2515_s0 + $0x18] sm:$0xff]  ;;  %v32_v24 = vpack.c.bf16 %v28_v19, %v27_v18  ;;  %vm146_vm1 = vcmask 130048   ;;  %v134_v2 = vld [vmem:[%s2518_s3] sm:$0xff]  ;;  %v1760_v4 = vmov 0   ;;  %vm282_vm6 = vcmask 523264  }
   0x9   :  { %112 = vmatpush.bf16.msra.mxu1 %v49_v6  ;;  %1530 = vmatpush.bf16.msra.mxu2 %v49_v6  ;;  %v35_v22 = vld [vmem:[%s2516_s1 + $0x10] sm:$0xff]  ;;  %v36_v23 = vld [vmem:[%s2516_s1 + $0x18] sm:$0xff]  ;;  %v30_v25 = vpack.c.bf16 %v24_v21, %v23_v20  ;;  %vm136_vm2 = vnez %v134_v2  ;;  %s1761_s29 = smov 96   ;;  %s1762_s5 = smov 80  }
   0xa   :  { %v42_v26 = vpack.c.bf16 %v36_v23, %v35_v22  ;;  %v39_v27 = vld [vmem:[%s2516_s1 + $0x30] sm:$0xff]  ;;  %v40_v28 = vld [vmem:[%s2516_s1 + $0x38] sm:$0xff]  ;;  %v216_v5 = vsel %vm136_vm2, 16843009, %v1760_v4  ;;  %s1764_s6 = smov 48   ;;  %s1765_s7 = smov 32  }
   0xb   :  { %1457 = vmatmul.msk.bf16.vlgmr.msra.gmra.mxu3 %vm51_vm0, %v31_v14  ;;  %1455 = vmatmul.msk.bf16.vlgmr.msra.gmra.mxu0 %vm51_vm0, %v29_v15  ;;  %v44_v29 = vpack.c.bf16 %v40_v28, %v39_v27  ;;  %v218_v6 = vunpack.c.0.s8 %v216_v5  ;;  %v219_v9 = vunpack.c.1.s8 %v216_v5  ;;  %v220_v13 = vunpack.c.2.s8 %v216_v5  ;;  %s1766_s8 = smov [#allocation2]   ;;  %s1443_s12 = sshll.u32 %s2519_s4, 4  ;;  %s1444_s12 = int_to_ptr.hbm [resolvable:$true] %s1443_s12 }
   0xc   :  { %1459 = vmatmul.msk.bf16.vlgmr.msra.gmra.mxu1 %vm51_vm0, %v41_v16  ;;  %1461 = vmatmul.msk.bf16.vlgmr.msra.gmra.mxu2 %vm51_vm0, %v43_v17  ;;  %v221_v23 = vunpack.c.3.s8 %v216_v5  ;;  %s1441_s9 = sshll.u32 %s1766_s8, 4  ;;  %s1767_s13 = smov 128   ;;  %s1442_s9 = int_to_ptr.vmem [resolvable:$true] %s1441_s9 }
   0xd   :  { %v226_v7 = vpack.c.b16 %v218_v6, %v218_v6  ;;  %v228_v10 = vpack.c.b16 %v219_v9, %v219_v9  ;;  %v230_v17 = vpack.c.b16 %v220_v13, %v220_v13  ;;  %s1768_s14 = smov 8  }
   0xe   :  { %v232_v28 = vpack.c.b16 %v221_v23, %v221_v23 }
   0xf   :  { %v227_v8 = vpack.c.b8 %v226_v7, %v226_v7  ;;  %v229_v12 = vpack.c.b8 %v228_v10, %v228_v10  ;;  %v231_v22 = vpack.c.b8 %v230_v17, %v230_v17 }
  0x11   :  { %vm242_vm3 = vnez %v227_v8  ;;  %vm243_vm4 = vnez %v229_v12  ;;  %vm244_vm7 = vnez %v231_v22 }
  0x12   :  { %v250_v11 = vsel %vm242_vm3, 16843009, %v1760_v4  ;;  %v251_v21 = vsel %vm243_vm4, 16843009, %v1760_v4 }
  0x13   :  { %v258_v15 = vunpack.c.0.s8 %v250_v11 }
  0x15   :  { %vm1921_vm5 = vcmp.ne.s32.totalorder %v258_v15, 0 }
  0x1b   :  { %1458 = vmatmul.msk.bf16.gmra.mxu3 %vm51_vm0, %v32_v24  ;;  %1456 = vmatmul.msk.bf16.gmra.mxu0 %vm51_vm0, %v30_v25 }
  0x1c   :  { %1460 = vmatmul.msk.bf16.gmra.mxu1 %vm51_vm0, %v42_v26  ;;  %1462 = vmatmul.msk.bf16.gmra.mxu2 %vm51_vm0, %v44_v29  ;;  %v259_v26 = vunpack.c.0.s8 %v251_v21 }
  0x1e   :  { %vm1932_vm8 = vcmp.ne.s32.totalorder %v259_v26, 0 }
  0x88   :  { %v73_v30 = vpop.f32.mrf.mxu0 }
  0x89   :  { %v114_v31 = vpop.f32.mrf.mxu1 }
  0x8e   :  { %v83_v32 = vpop.f32.mrf.mxu3 }
  0x8f   :  { %v124_v52 = vpop.f32.mrf.mxu2 }
  0x90   :  { %v75_v33 = vpop.f32.mrf.mxu0 }
  0x91   :  { %v1862_v34 = vpack.c.bf16 %v75_v33, %v73_v30  ;;  %v116_v35 = vpop.f32.mrf.mxu1  ;;  %v233_v33 = vpack.c.b8 %v232_v28, %v232_v28 }
  0x92   :  { %v1864_v36 = vpack.c.bf16 %v116_v35, %v114_v31 }
  0x93   :  { %488 = vrot.lane.b32.xlu2 %v1862_v34, %s1759_s27  ;;  %v160_v51 = vsel %vm146_vm1, %v1862_v34, 0  ;;  %vm245_vm9 = vnez %v233_v33 }
  0x94   :  { %476 = vrot.lane.b32.xlu0 %v1864_v36, %s1759_s27 }
  0x96   :  { %v85_v37 = vpop.f32.mrf.mxu3 }
  0x97   :  { %v1870_v38 = vpack.c.bf16 %v85_v37, %v83_v32  ;;  %v126_v53 = vpop.f32.mrf.mxu2  ;;  %v252_v32 = vsel %vm244_vm7, 16843009, %v1760_v4 }
  0x98   :  { %v78_v39 = vpop.f32.mrf.mxu0  ;;  %v1902_v54 = vpack.c.bf16 %v126_v53, %v124_v52 }
  0x99   :  { %492 = vrot.lane.b32.xlu1 %v1870_v38, %s1759_s27  ;;  %v119_v46 = vpop.f32.mrf.mxu1  ;;  %v166_v47 = vsel %vm146_vm1, %v1870_v38, 0 }
  0x9e   :  { %v88_v40 = vpop.f32.mrf.mxu3 }
  0x9f   :  { %v129_v55 = vpop.f32.mrf.mxu2 }
  0xa0   :  { %v80_v41 = vpop.f32.mrf.mxu0 }
  0xa1   :  { %v1874_v42 = vpack.c.bf16 %v80_v41, %v78_v39  ;;  %v121_v48 = vpop.f32.mrf.mxu1  ;;  %v260_v39 = vunpack.c.0.s8 %v252_v32 }
  0xa2   :  { %v1889_v49 = vpack.c.bf16 %v121_v48, %v119_v46  ;;  %v253_v46 = vsel %vm245_vm9, 16843009, %v1760_v4 }
  0xa3   :  { %490 = vrot.lane.b32.xlu2 %v1874_v42, %s1759_s27  ;;  %v163_v50 = vsel %vm146_vm1, %v1874_v42, 0  ;;  %vm1943_vm10 = vcmp.ne.s32.totalorder %v260_v39, 0 }
  0xa4   :  { %478 = vrot.lane.b32.xlu1 %v1889_v49, %s1759_s27 }
  0xa6   :  { %v90_v43 = vpop.f32.mrf.mxu3 }
  0xa7   :  { %v1878_v44 = vpack.c.bf16 %v90_v43, %v88_v40  ;;  %v131_v56 = vpop.f32.mrf.mxu2 }
  0xa8   :  { %v1906_v57 = vpack.c.bf16 %v131_v56, %v129_v55 }
  0xa9   :  { %494 = vrot.lane.b32.xlu0 %v1878_v44, %s1759_s27  ;;  %375 = vmatpush.bf16.msrb.mxu3 %v1878_v44  ;;  %v169_v45 = vsel %vm146_vm1, %v1878_v44, 0 }
  0xaa   :  { %175 = vmatpush.bf16.xpose.msrb.mxu2 %v169_v45 }
  0xad   :  { %376 = vmatpush.bf16.msrb.mxu3 %v1870_v38 }
  0xb1   :  { %377 = vmatpush.bf16.msrb.mxu3 %v1874_v42 }
  0xb2   :  { %176 = vmatpush.bf16.xpose.msrb.mxu2 %v166_v47 }
  0xb5   :  { %378 = vmatpush.bf16.msrb.mxu3 %v1862_v34 }
  0xba   :  { %177 = vmatpush.bf16.xpose.msrb.mxu2 %v163_v50  ;;  %v261_v50 = vunpack.c.0.s8 %v253_v46 }
  0xbc   :  { %vm1954_vm11 = vcmp.ne.s32.totalorder %v261_v50, 0 }
  0xc2   :  { %178 = vmatpush.bf16.xpose.msrb.mxu2 %v160_v51 }
  0xc9   :  { %1463 = vmatmul.msk.bf16.vlgmr.msrb.gmra.mxu2 %vm146_vm1, %v1864_v36 }
  0xd9   :  { %1464 = vmatmul.msk.bf16.gmra.mxu2 %vm146_vm1, %v1889_v49 }
  0xe9   :  { %1465 = vmatmul.msk.bf16.gmra.mxu2 %vm146_vm1, %v1902_v54 }
  0xed   :  { %v489_v59 = vpop.permute.xlu2 %488 }
  0xee   :  { %v509_v3 = vsel %vm146_vm1, %v489_v59, 0 }
  0xf9   :  { %1466 = vmatmul.msk.bf16.gmra.mxu2 %vm146_vm1, %v1906_v57 }
  0xfd   :  { %v491_v63 = vpop.permute.xlu2 %490 }
  0xfe   :  { %v512_v1 = vsel %vm146_vm1, %v491_v63, 0 }
 0x106   :  { %v477_v58 = vpop.permute.xlu0 %476 }
 0x10b   :  { %v493_v62 = vpop.permute.xlu1 %492 }
 0x10c   :  { %v515_v0 = vsel %vm146_vm1, %v493_v62, 0 }
 0x116   :  { %v479_v14 = vpop.permute.xlu1 %478 }
 0x11b   :  { %v495_v60 = vpop.permute.xlu0 %494 }
 0x11c   :  { %669 = vmatpush.bf16.msrb.mxu1 %v495_v60  ;;  %v518_v61 = vsel %vm146_vm1, %v495_v60, 0 }
 0x11d   :  { %524 = vmatpush.bf16.xpose.msrb.mxu0 %v518_v61 }
 0x120   :  { %670 = vmatpush.bf16.msrb.mxu1 %v493_v62 }
 0x124   :  { %671 = vmatpush.bf16.msrb.mxu1 %v491_v63 }
 0x125   :  { %525 = vmatpush.bf16.xpose.msrb.mxu0 %v515_v0 }
 0x128   :  { %672 = vmatpush.bf16.msrb.mxu1 %v489_v59  ;;  %v135_v59 = vld [vmem:[%s2518_s3 + $0x8] sm:$0xff]  ;;  %s1763_s3 = smov 16  }
 0x129   :  { %vm137_vm12 = vnez %v135_v59 }
 0x12a   :  { %v217_v60 = vsel %vm137_vm12, 16843009, %v1760_v4 }
 0x12b   :  { %v222_v61 = vunpack.c.0.s8 %v217_v60  ;;  %v223_v5 = vunpack.c.1.s8 %v217_v60  ;;  %v224_v6 = vunpack.c.2.s8 %v217_v60  ;;  %v225_v33 = vunpack.c.3.s8 %v217_v60 }
 0x12d   :  { %526 = vmatpush.bf16.xpose.msrb.mxu0 %v512_v1  ;;  %v234_v62 = vpack.c.b16 %v222_v61, %v222_v61  ;;  %v236_v9 = vpack.c.b16 %v223_v5, %v223_v5  ;;  %v238_v10 = vpack.c.b16 %v224_v6, %v224_v6 }
 0x12f   :  { %v235_v63 = vpack.c.b8 %v234_v62, %v234_v62  ;;  %v237_v12 = vpack.c.b8 %v236_v9, %v236_v9  ;;  %v239_v13 = vpack.c.b8 %v238_v10, %v238_v10 }
 0x131   :  { %vm246_vm13 = vnez %v235_v63  ;;  %vm247_vm15 = vnez %v237_v12  ;;  %vm248_vm0 = vnez %v239_v13 }
 0x132   :  { %v254_v0 = vsel %vm246_vm13, 16843009, %v1760_v4  ;;  %v255_v15 = vsel %vm247_vm15, 16843009, %v1760_v4 }
 0x133   :  { %v263_v21 = vunpack.c.0.s8 %v255_v15 }
 0x135   :  { %527 = vmatpush.bf16.xpose.msrb.mxu0 %v509_v3  ;;  %v262_v3 = vunpack.c.0.s8 %v254_v0  ;;  %vm1991_vm2 = vcmp.ne.s32.totalorder %v263_v21, 0 }
 0x137   :  { %vm1979_vm14 = vcmp.ne.s32.totalorder %v262_v3, 0 }
 0x13c   :  { %1479 = vmatmul.msk.bf16.vlgmr.msrb.gmra.mxu0 %vm146_vm1, %v477_v58 }
 0x14c   :  { %v180_v16 = vpop.f32.mrf.mxu2  ;;  %1480 = vmatmul.msk.bf16.gmra.mxu0 %vm146_vm1, %v479_v14 }
 0x14d   :  { %v200_v18 = vmul.f32 0.2, %v180_v16 }
 0x14f   :  { %v208_v20 = vmax.f32 %v180_v16, %v200_v18  ;;  %v256_v16 = vsel %vm248_vm0, 16843009, %v1760_v4 }
 0x150   :  { %v264_v22 = vunpack.c.0.s8 %v256_v16 }
 0x151   :  { %v1928_v24 = vsel %vm1921_vm5, %v208_v20, -1e+30 }
 0x152   :  { %v283_v25 = vsel %vm282_vm6, %v1928_v24, -inf  ;;  %vm1995_vm3 = vcmp.ne.s32.totalorder %v264_v22, 0 }
 0x153   :  { %284 = vmax.xlane.f32.xlu0 %v283_v25 }
 0x154   :  { %v182_v27 = vpop.f32.mrf.mxu2 }
 0x155   :  { %v201_v29 = vmul.f32 0.2, %v182_v27 }
 0x157   :  { %v209_v31 = vmax.f32 %v182_v27, %v201_v29 }
 0x159   :  { %v1939_v35 = vsel %vm1932_vm8, %v209_v31, -1e+30 }
 0x15a   :  { %v286_v37 = vsel %vm282_vm6, %v1939_v35, -inf }
 0x15b   :  { %287 = vmax.xlane.f32.xlu1 %v286_v37  ;;  %v240_v37 = vpack.c.b16 %v225_v33, %v225_v33 }
 0x15c   :  { %v185_v40 = vpop.f32.mrf.mxu2 }
 0x15d   :  { %v202_v41 = vmul.f32 0.2, %v185_v40  ;;  %v241_v39 = vpack.c.b8 %v240_v37, %v240_v37 }
 0x15f   :  { %v210_v45 = vmax.f32 %v185_v40, %v202_v41  ;;  %vm249_vm4 = vnez %v241_v39 }
 0x161   :  { %v1950_v47 = vsel %vm1943_vm10, %v210_v45, -1e+30  ;;  %v257_v45 = vsel %vm249_vm4, 16843009, %v1760_v4 }
 0x162   :  { %v289_v48 = vsel %vm282_vm6, %v1950_v47, -inf  ;;  %v265_v50 = vunpack.c.0.s8 %v257_v45 }
 0x163   :  { %290 = vmax.xlane.f32.xlu2 %v289_v48 }
 0x164   :  { %v187_v51 = vpop.f32.mrf.mxu2  ;;  %vm2024_vm7 = vcmp.ne.s32.totalorder %v265_v50, 0 }
 0x165   :  { %v203_v52 = vmul.f32 0.2, %v187_v51 }
 0x167   :  { %v211_v55 = vmax.f32 %v187_v51, %v203_v52  ;;  %480 = vrot.lane.b32.xlu0 %v1902_v54, %s1759_s27 }
 0x169   :  { %v1962_v56 = vsel %vm1954_vm11, %v211_v55, -1e+30 }
 0x16a   :  { %v292_v58 = vsel %vm282_vm6, %v1962_v56, -inf }
 0x16b   :  { %293 = vmax.xlane.f32.xlu1 %v292_v58 }
 0x16c   :  { %v190_v1 = vpop.f32.mrf.mxu2 }
 0x16d   :  { %v204_v2 = vmul.f32 0.2, %v190_v1 }
 0x16f   :  { %809 = vrot.lane.b32.xlu0 %v1874_v42, %s1761_s29  ;;  %v212_v7 = vmax.f32 %v190_v1, %v204_v2 }
 0x171   :  { %v1985_v11 = vsel %vm1979_vm14, %v212_v7, -1e+30 }
 0x172   :  { %v295_v14 = vsel %vm282_vm6, %v1985_v11, -inf }
 0x17b   :  { %811 = vrot.lane.b32.xlu2 %v1870_v38, %s1761_s29 }
 0x183   :  { %1132 = vrot.lane.b32.xlu2 %v1878_v44, %s1762_s5 }
 0x184   :  { %813 = vrot.lane.b32.xlu1 %v1878_v44, %s1761_s29  ;;  %v192_v44 = vpop.f32.mrf.mxu2 }
 0x185   :  { %v205_v18 = vmul.f32 0.2, %v192_v44 }
 0x187   :  { %v213_v23 = vmax.f32 %v192_v44, %v205_v18 }
 0x189   :  { %v2001_v28 = vsel %vm1991_vm2, %v213_v23, -1e+30 }
 0x18a   :  { %v298_v31 = vsel %vm282_vm6, %v2001_v28, -inf }
 0x18c   :  { %v195_v17 = vpop.f32.mrf.mxu2 }
 0x18d   :  { %v206_v20 = vmul.f32 0.2, %v195_v17 }
 0x18f   :  { %v214_v25 = vmax.f32 %v195_v17, %v206_v20 }
 0x191   :  { %v2005_v29 = vsel %vm1995_vm3, %v214_v25, -1e+30 }
 0x192   :  { %v301_v32 = vsel %vm282_vm6, %v2005_v29, -inf }
 0x194   :  { %v197_v41 = vpop.f32.mrf.mxu2 }
 0x195   :  { %v207_v48 = vmul.f32 0.2, %v197_v41 }
 0x197   :  { %v215_v55 = vmax.f32 %v197_v41, %v207_v48 }
 0x199   :  { %296 = vmax.xlane.f32.xlu0 %v295_v14 }
 0x1ac   :  { %299 = vmax.xlane.f32.xlu2 %v298_v31 }
 0x1ad   :  { %807 = vrot.lane.b32.xlu0 %v1862_v34, %s1761_s29 }
 0x1ae   :  { %302 = vmax.xlane.f32.xlu1 %v301_v32 }
 0x1b9   :  { %v529_v3 = vpop.f32.mrf.mxu0 }
 0x1ba   :  { %v549_v18 = vmul.f32 0.2, %v529_v3 }
 0x1bc   :  { %v557_v20 = vmax.f32 %v529_v3, %v549_v18 }
 0x1be   :  { %v2079_v23 = vsel %vm1921_vm5, %v557_v20, -1e+30 }
 0x1bf   :  { %v573_v25 = vsel %vm282_vm6, %v2079_v23, -inf }
 0x1c1   :  { %v531_v10 = vpop.f32.mrf.mxu0 }
 0x1c2   :  { %v550_v48 = vmul.f32 0.2, %v531_v10 }
 0x1c4   :  { %1130 = vrot.lane.b32.xlu2 %v1870_v38, %s1762_s5 }
 0x1c6   :  { %v285_v40 = vpop.xlane.xlu0 %284 }
 0x1c7   :  { %482 = vrot.lane.b32.xlu1 %v1906_v57, %s1759_s27  ;;  %v307_v46 = vsub.f32 %v1928_v24, %v285_v40  ;;  %v2030_v24 = vsel %vm2024_vm7, %v215_v55, -1e+30 }
 0x1c9   :  { %v315_v51 = vmul.f32 1.442695, %v307_v46 }
 0x1cb   :  { %1541 = vpow2.f32 %v315_v51  ;;  %v558_v51 = vmax.f32 %v531_v10, %v550_v48 }
 0x1cc   :  { %1128 = vrot.lane.b32.xlu2 %v1874_v42, %s1762_s5 }
 0x1ce   :  { %v288_v52 = vpop.xlane.xlu1 %287 }
 0x1cf   :  { %v308_v38 = vsub.f32 %v1939_v35, %v288_v52  ;;  %803 = vrot.lane.b32.xlu1 %v1902_v54, %s1761_s29  ;;  %v304_v35 = vsel %vm282_vm6, %v2030_v24, -inf }
 0x1d1   :  { %v317_v4 = vmul.f32 1.442695, %v308_v38  ;;  %v2038_v59 = vpop.eup %1541 }
 0x1d3   :  { %1543 = vpow2.f32 %v317_v4 }
 0x1d4   :  { %1126 = vrot.lane.b32.xlu2 %v1862_v34, %s1762_s5 }
 0x1d6   :  { %v291_v42 = vpop.xlane.xlu2 %290 }
 0x1d7   :  { %1124 = vrot.lane.b32.xlu1 %v1906_v57, %s1762_s5  ;;  %305 = vmax.xlane.f32.xlu0 %v304_v35  ;;  %v309_v62 = vsub.f32 %v1950_v47, %v291_v42 }
 0x1d9   :  { %v2040_v60 = vpop.eup %1543  ;;  %v481_v61 = vpop.permute.xlu0 %480  ;;  %v319_v63 = vmul.f32 1.442695, %v309_v62 }
 0x1da   :  { %1481 = vmatmul.msk.bf16.gmra.mxu0 %vm146_vm1, %v481_v61  ;;  %v355_v34 = vpack.c.bf16 %v2040_v60, %v2038_v59 }
 0x1db   :  { %1545 = vpow2.f32 %v319_v63 }
 0x1dc   :  { %1467 = vmatmul.msk.bf16.vlgmr.msrb.gmra.mxu3 %vm282_vm6, %v355_v34  ;;  %801 = vrot.lane.b32.xlu2 %v1889_v49, %s1761_s29 }
 0x1de   :  { %v812_v0 = vpop.permute.xlu2 %811  ;;  %v294_v1 = vpop.xlane.xlu1 %293 }
 0x1df   :  { %v310_v2 = vsub.f32 %v1962_v56, %v294_v1 }
 0x1e1   :  { %v321_v5 = vmul.f32 1.442695, %v310_v2  ;;  %v2053_v7 = vpop.eup %1545  ;;  %v810_v16 = vpop.permute.xlu0 %809 }
 0x1e3   :  { %1547 = vpow2.f32 %v321_v5 }
 0x1e4   :  { %1122 = vrot.lane.b32.xlu2 %v1902_v54, %s1762_s5  ;;  %v534_v54 = vpop.f32.mrf.mxu0 }
 0x1e5   :  { %v551_v44 = vmul.f32 0.2, %v534_v54 }
 0x1e6   :  { %v1133_v47 = vpop.permute.xlu2 %1132 }
 0x1e7   :  { %v1156_v6 = vsel %vm146_vm1, %v1133_v47, 0  ;;  %1307 = vmatpush.bf16.msra.mxu1 %v1133_v47  ;;  %v559_v14 = vmax.f32 %v534_v54, %v551_v44 }
 0x1e8   :  { %1162 = vmatpush.bf16.xpose.msra.mxu0 %v1156_v6 }
 0x1e9   :  { %v2055_v9 = vpop.eup %1547  ;;  %v2069_v15 = vsel %vm1943_vm10, %v559_v14, -1e+30 }
 0x1ea   :  { %v356_v56 = vpack.c.bf16 %v2055_v9, %v2053_v7  ;;  %v579_v17 = vsel %vm282_vm6, %v2069_v15, -inf }
 0x1eb   :  { %799 = vrot.lane.b32.xlu0 %v1864_v36, %s1761_s29 }
 0x1ec   :  { %1468 = vmatmul.msk.bf16.gmra.mxu3 %vm282_vm6, %v356_v56  ;;  %v536_v21 = vpop.f32.mrf.mxu0 }
 0x1ed   :  { %v552_v22 = vmul.f32 0.2, %v536_v21 }
 0x1ef   :  { %v560_v31 = vmax.f32 %v536_v21, %v552_v22 }
 0x1f1   :  { %v2085_v32 = vsel %vm1954_vm11, %v560_v31, -1e+30 }
 0x1f3   :  { %1118 = vrot.lane.b32.xlu0 %v1864_v36, %s1762_s5  ;;  %v834_v36 = vsel %vm146_vm1, %v812_v0, 0 }
 0x1f6   :  { %v814_v12 = vpop.permute.xlu1 %813 }
 0x1f7   :  { %v837_v13 = vsel %vm146_vm1, %v814_v12, 0  ;;  %988 = vmatpush.bf16.msra.mxu2 %v814_v12 }
 0x1f8   :  { %843 = vmatpush.bf16.xpose.msra.mxu3 %v837_v13 }
 0x1fb   :  { %989 = vmatpush.bf16.msra.mxu2 %v812_v0  ;;  %1120 = vrot.lane.b32.xlu0 %v1889_v49, %s1762_s5  ;;  %v831_v49 = vsel %vm146_vm1, %v810_v16, 0 }
 0x1ff   :  { %990 = vmatpush.bf16.msra.mxu2 %v810_v16 }
 0x200   :  { %844 = vmatpush.bf16.xpose.msra.mxu3 %v834_v36 }
 0x201   :  { %580 = vmax.xlane.f32.xlu1 %v579_v17 }
 0x203   :  { %805 = vrot.lane.b32.xlu0 %v1906_v57, %s1761_s29  ;;  %v582_v57 = vsel %vm282_vm6, %v2085_v32, -inf }
 0x208   :  { %845 = vmatpush.bf16.xpose.msra.mxu3 %v831_v49 }
 0x20c   :  { %v297_v33 = vpop.xlane.xlu0 %296 }
 0x20d   :  { %574 = vmax.xlane.f32.xlu2 %v573_v25  ;;  %v311_v37 = vsub.f32 %v1985_v11, %v297_v33  ;;  %v566_v11 = vsel %vm1932_vm8, %v558_v51, -1e+30 }
 0x20e   :  { %v576_v42 = vsel %vm282_vm6, %v566_v11, -inf }
 0x20f   :  { %v323_v39 = vmul.f32 1.442695, %v311_v37 }
 0x211   :  { %1549 = vpow2.f32 %v323_v39 }
 0x215   :  { %583 = vmax.xlane.f32.xlu2 %v582_v57 }
 0x217   :  { %v2093_v38 = vpop.eup %1549 }
 0x21f   :  { %v808_v40 = vpop.permute.xlu0 %807  ;;  %v300_v41 = vpop.xlane.xlu2 %299 }
 0x220   :  { %v312_v45 = vsub.f32 %v2001_v28, %v300_v41  ;;  %991 = vmatpush.bf16.msra.mxu2 %v808_v40  ;;  %v828_v46 = vsel %vm146_vm1, %v808_v40, 0 }
 0x221   :  { %846 = vmatpush.bf16.xpose.msra.mxu3 %v828_v46  ;;  %v303_v62 = vpop.xlane.xlu1 %302 }
 0x222   :  { %v325_v50 = vmul.f32 1.442695, %v312_v45  ;;  %v313_v1 = vsub.f32 %v2005_v29, %v303_v62 }
 0x224   :  { %1551 = vpow2.f32 %v325_v50  ;;  %v327_v2 = vmul.f32 1.442695, %v313_v1 }
 0x226   :  { %1553 = vpow2.f32 %v327_v2 }
 0x227   :  { %v1131_v52 = vpop.permute.xlu2 %1130 }
 0x228   :  { %1308 = vmatpush.bf16.msra.mxu1 %v1131_v52  ;;  %v1153_v55 = vsel %vm146_vm1, %v1131_v52, 0 }
 0x229   :  { %1163 = vmatpush.bf16.xpose.msra.mxu0 %v1153_v55 }
 0x22a   :  { %v2097_v28 = vpop.eup %1551 }
 0x22b   :  { %v357_v4 = vpack.c.bf16 %v2097_v28, %v2093_v38  ;;  %v346_v8 = vsel %vm282_vm6, %v2097_v28, 0.0 }
 0x22c   :  { %v2108_v6 = vpop.eup %1553 }
 0x22d   :  { %1469 = vmatmul.msk.bf16.gmra.mxu3 %vm282_vm6, %v357_v4  ;;  %577 = vmax.xlane.f32.xlu0 %v576_v42 }
 0x22f   :  { %v1129_v35 = vpop.permute.xlu2 %1128 }
 0x230   :  { %1309 = vmatpush.bf16.msra.mxu1 %v1129_v35  ;;  %v1150_v61 = vsel %vm146_vm1, %v1129_v35, 0 }
 0x231   :  { %1164 = vmatpush.bf16.xpose.msra.mxu0 %v1150_v61 }
 0x237   :  { %v1127_v34 = vpop.permute.xlu2 %1126 }
 0x238   :  { %1310 = vmatpush.bf16.msra.mxu1 %v1127_v34  ;;  %v1147_v63 = vsel %vm146_vm1, %v1127_v34, 0 }
 0x239   :  { %1165 = vmatpush.bf16.xpose.msra.mxu0 %v1147_v63  ;;  %v483_v0 = vpop.permute.xlu1 %482 }
 0x23a   :  { %1482 = vmatmul.msk.bf16.gmra.mxu0 %vm146_vm1, %v483_v0 }
 0x23f   :  { %v802_v49 = vpop.permute.xlu2 %801 }
 0x241   :  { %v804_v25 = vpop.permute.xlu1 %803 }
 0x247   :  { %v1123_v22 = vpop.permute.xlu2 %1122 }
 0x249   :  { %v1125_v31 = vpop.permute.xlu1 %1124 }
 0x24a   :  { %v306_v3 = vpop.xlane.xlu0 %305 }
 0x24b   :  { %v314_v5 = vsub.f32 %v2030_v24, %v306_v3 }
 0x24d   :  { %v329_v47 = vmul.f32 1.442695, %v314_v5 }
 0x24f   :  { %1555 = vpow2.f32 %v329_v47 }
 0x255   :  { %v2110_v10 = vpop.eup %1555 }
 0x256   :  { %v358_v56 = vpack.c.bf16 %v2110_v10, %v2108_v6 }
 0x257   :  { %v539_v54 = vpop.f32.mrf.mxu0 }
 0x258   :  { %v553_v44 = vmul.f32 0.2, %v539_v54  ;;  %1470 = vmatmul.msk.bf16.gmra.mxu3 %vm282_vm6, %v358_v56 }
 0x25a   :  { %v561_v12 = vmax.f32 %v539_v54, %v553_v44 }
 0x25c   :  { %v2117_v29 = vsel %vm1979_vm14, %v561_v12, -1e+30 }
 0x25d   :  { %v800_v24 = vpop.permute.xlu0 %799  ;;  %v585_v13 = vsel %vm282_vm6, %v2117_v29, -inf }
 0x25e   :  { %586 = vmax.xlane.f32.xlu0 %v585_v13 }
 0x25f   :  { %v541_v14 = vpop.f32.mrf.mxu0  ;;  %v2136_v45 = vpop.f32.mrf.mxu3 }
 0x260   :  { %v554_v16 = vmul.f32 0.2, %v541_v14 }
 0x262   :  { %v562_v36 = vmax.f32 %v541_v14, %v554_v16 }
 0x264   :  { %v2123_v17 = vsel %vm1991_vm2, %v562_v36, -1e+30 }
 0x265   :  { %v1119_v18 = vpop.permute.xlu0 %1118  ;;  %v588_v20 = vsel %vm282_vm6, %v2123_v17, -inf }
 0x266   :  { %589 = vmax.xlane.f32.xlu1 %v588_v20  ;;  %1511 = vmatmul.msk.bf16.vlgmr.msra.gmra.mxu0 %vm146_vm1, %v1119_v18 }
 0x268   :  { %1495 = vmatmul.msk.bf16.vlgmr.msra.gmra.mxu3 %vm146_vm1, %v800_v24 }
 0x26d   :  { %v1121_v21 = vpop.permute.xlu0 %1120 }
 0x274   :  { %v581_v51 = vpop.xlane.xlu1 %580 }
 0x275   :  { %v806_v57 = vpop.permute.xlu0 %805 }
 0x276   :  { %1512 = vmatmul.msk.bf16.gmra.mxu0 %vm146_vm1, %v1121_v21 }
 0x278   :  { %1496 = vmatmul.msk.bf16.gmra.mxu3 %vm146_vm1, %v802_v49 }
 0x280   :  { %v575_v33 = vpop.xlane.xlu2 %574 }
 0x281   :  { %v597_v37 = vsub.f32 %v2079_v23, %v575_v33  ;;  %v2145_v23 = vpop.f32.mrf.mxu3 }
 0x283   :  { %v605_v39 = vmul.f32 1.442695, %v597_v37 }
 0x285   :  { %1557 = vpow2.f32 %v605_v39 }
 0x286   :  { %1513 = vmatmul.msk.bf16.gmra.mxu0 %vm146_vm1, %v1123_v22 }
 0x288   :  { %1497 = vmatmul.msk.bf16.gmra.mxu3 %vm146_vm1, %v804_v25  ;;  %v584_v48 = vpop.xlane.xlu2 %583 }
 0x289   :  { %v600_v55 = vsub.f32 %v2085_v32, %v584_v48  ;;  %v2149_v61 = vpop.f32.mrf.mxu3 }
 0x28b   :  { %v2138_v50 = vpop.eup %1557  ;;  %v611_v42 = vmul.f32 1.442695, %v600_v55 }
 0x291   :  { %v2164_v47 = vpop.f32.mrf.mxu3 }
 0x296   :  { %1514 = vmatmul.msk.bf16.gmra.mxu0 %vm146_vm1, %v1125_v31 }
 0x298   :  { %1498 = vmatmul.msk.bf16.gmra.mxu3 %vm146_vm1, %v806_v57 }
 0x2a0   :  { %v578_v40 = vpop.xlane.xlu0 %577 }
 0x2a1   :  { %v598_v41 = vsub.f32 %v566_v11, %v578_v40  ;;  %v599_v11 = vsub.f32 %v2069_v15, %v581_v51 }
 0x2a3   :  { %v607_v46 = vmul.f32 1.442695, %v598_v41  ;;  %v609_v35 = vmul.f32 1.442695, %v599_v11 }
 0x2a5   :  { %1559 = vpow2.f32 %v607_v46 }
 0x2a6   :  { %1561 = vpow2.f32 %v611_v42 }
 0x2a7   :  { %1563 = vpow2.f32 %v609_v35 }
 0x2ab   :  { %v2140_v52 = vpop.eup %1559 }
 0x2ac   :  { %v645_v4 = vpack.c.bf16 %v2140_v52, %v2138_v50  ;;  %v2151_v63 = vpop.eup %1561 }
 0x2ad   :  { %v2153_v0 = vpop.eup %1563 }
 0x2ae   :  { %1483 = vmatmul.msk.bf16.vlgmr.msrb.gmra.mxu1 %vm282_vm6, %v645_v4  ;;  %v646_v15 = vpack.c.bf16 %v2151_v63, %v2153_v0  ;;  %v627_v27 = vsel %vm282_vm6, %v2153_v0, 0.0 }
 0x2b0   :  { %v2172_v12 = vpop.f32.mrf.mxu3 }
 0x2b7   :  { %v544_v62 = vpop.f32.mrf.mxu0 }
 0x2b8   :  { %v555_v34 = vmul.f32 0.2, %v544_v62  ;;  %v2174_v13 = vpop.f32.mrf.mxu3 }
 0x2ba   :  { %v563_v32 = vmax.f32 %v544_v62, %v555_v34 }
 0x2bc   :  { %v2157_v1 = vsel %vm1995_vm3, %v563_v32, -1e+30 }
 0x2bd   :  { %v591_v2 = vsel %vm282_vm6, %v2157_v1, -inf }
 0x2be   :  { %592 = vmax.xlane.f32.xlu2 %v591_v2  ;;  %1484 = vmatmul.msk.bf16.gmra.mxu1 %vm282_vm6, %v646_v15 }
 0x2bf   :  { %v546_v3 = vpop.f32.mrf.mxu0 }
 0x2c0   :  { %v556_v5 = vmul.f32 0.2, %v546_v3 }
 0x2c2   :  { %v564_v56 = vmax.f32 %v546_v3, %v556_v5 }
 0x2c4   :  { %v2168_v54 = vsel %vm2024_vm7, %v564_v56, -1e+30 }
 0x2c5   :  { %v594_v44 = vsel %vm282_vm6, %v2168_v54, -inf }
 0x2c6   :  { %595 = vmax.xlane.f32.xlu0 %v594_v44 }
 0x2d1   :  { %v587_v24 = vpop.xlane.xlu0 %586 }
 0x2d2   :  { %v601_v14 = vsub.f32 %v2117_v29, %v587_v24 }
 0x2d4   :  { %v613_v16 = vmul.f32 1.442695, %v601_v14 }
 0x2d6   :  { %1565 = vpow2.f32 %v613_v16 }
 0x2d9   :  { %v590_v36 = vpop.xlane.xlu1 %589 }
 0x2da   :  { %v602_v18 = vsub.f32 %v2123_v17, %v590_v36 }
 0x2db   :  { %v2178_v20 = vpop.f32.mrf.mxu3 }
 0x2dc   :  { %v615_v21 = vmul.f32 1.442695, %v602_v18  ;;  %v2180_v49 = vpop.eup %1565 }
 0x2de   :  { %1567 = vpow2.f32 %v615_v21 }
 0x2e3   :  { %v2182_v22 = vpop.f32.mrf.mxu3  ;;  %v1167_v25 = vpop.f32.mrf.mxu0 }
 0x2e4   :  { %v2184_v31 = vpop.eup %1567  ;;  %v1187_v57 = vmul.f32 0.2, %v1167_v25 }
 0x2e5   :  { %v647_v29 = vpack.c.bf16 %v2184_v31, %v2180_v49 }
 0x2e6   :  { %v1195_v33 = vmax.f32 %v1167_v25, %v1187_v57 }
 0x2e7   :  { %1485 = vmatmul.msk.bf16.gmra.mxu1 %vm282_vm6, %v647_v29 }
 0x2e8   :  { %v2191_v17 = vsel %vm1921_vm5, %v1195_v33, -1e+30 }
 0x2e9   :  { %v1211_v37 = vsel %vm282_vm6, %v2191_v17, -inf }
 0x2ea   :  { %1212 = vmax.xlane.f32.xlu0 %v1211_v37 }
 0x2eb   :  { %v848_v39 = vpop.f32.mrf.mxu3  ;;  %v1169_v40 = vpop.f32.mrf.mxu0 }
 0x2ec   :  { %v1188_v41 = vmul.f32 0.2, %v1169_v40  ;;  %v868_v46 = vmul.f32 0.2, %v848_v39 }
 0x2ee   :  { %v1196_v48 = vmax.f32 %v1169_v40, %v1188_v41  ;;  %v876_v4 = vmax.f32 %v848_v39, %v868_v46 }
 0x2f0   :  { %v2197_v51 = vsel %vm1932_vm8, %v1196_v48, -1e+30  ;;  %v2203_v62 = vsel %vm1921_vm5, %v876_v4, -1e+30 }
 0x2f1   :  { %v1214_v55 = vsel %vm282_vm6, %v2197_v51, -inf  ;;  %v892_v34 = vsel %vm282_vm6, %v2203_v62, -inf }
 0x2f2   :  { %1215 = vmax.xlane.f32.xlu1 %v1214_v55 }
 0x2f3   :  { %v850_v11 = vpop.f32.mrf.mxu3  ;;  %v1172_v42 = vpop.f32.mrf.mxu0 }
 0x2f4   :  { %v1189_v35 = vmul.f32 0.2, %v1172_v42  ;;  %v869_v5 = vmul.f32 0.2, %v850_v11 }
 0x2f6   :  { %v1197_v32 = vmax.f32 %v1172_v42, %v1189_v35  ;;  %v877_v16 = vmax.f32 %v850_v11, %v869_v5 }
 0x2f8   :  { %v2209_v44 = vsel %vm1943_vm10, %v1197_v32, -1e+30  ;;  %v2221_v25 = vsel %vm1932_vm8, %v877_v16, -1e+30  ;;  %v331_v16 = vsel %vm282_vm6, %v2038_v59, 0.0  ;;  %v337_v59 = vsel %vm282_vm6, %v2053_v7, 0.0 }
 0x2f9   :  { %v1217_v19 = vsel %vm282_vm6, %v2209_v44, -inf  ;;  %v895_v57 = vsel %vm282_vm6, %v2221_v25, -inf }
 0x2fa   :  { %893 = vmax.xlane.f32.xlu1 %v892_v34 }
 0x2fb   :  { %v853_v15 = vpop.f32.mrf.mxu3  ;;  %v1174_v2 = vpop.f32.mrf.mxu0 }
 0x2fc   :  { %v1190_v3 = vmul.f32 0.2, %v1174_v2  ;;  %v870_v40 = vmul.f32 0.2, %v853_v15 }
 0x2fe   :  { %v1198_v56 = vmax.f32 %v1174_v2, %v1190_v3  ;;  %v878_v4 = vmax.f32 %v853_v15, %v870_v40 }
 0x300   :  { %v2213_v24 = vsel %vm1954_vm11, %v1198_v56, -1e+30  ;;  %v2239_v34 = vsel %vm1943_vm10, %v878_v4, -1e+30 }
 0x301   :  { %v1220_v14 = vsel %vm282_vm6, %v2213_v24, -inf  ;;  %v898_v3 = vsel %vm282_vm6, %v2239_v34, -inf }
 0x302   :  { %1218 = vmax.xlane.f32.xlu1 %v1217_v19  ;;  %1221 = vmax.xlane.f32.xlu2 %v1220_v14 }
 0x303   :  { %v855_v36 = vpop.f32.mrf.mxu3  ;;  %v1177_v18 = vpop.f32.mrf.mxu0 }
 0x304   :  { %v1191_v21 = vmul.f32 0.2, %v1177_v18 }
 0x306   :  { %v1199_v29 = vmax.f32 %v1177_v18, %v1191_v21  ;;  %v334_v18 = vsel %vm282_vm6, %v2040_v60, 0.0 }
 0x308   :  { %v2227_v46 = vsel %vm1979_vm14, %v1199_v29, -1e+30 }
 0x309   :  { %v1223_v30 = vsel %vm282_vm6, %v2227_v46, -inf }
 0x30a   :  { %896 = vmax.xlane.f32.xlu2 %v895_v57  ;;  %v871_v57 = vmul.f32 0.2, %v855_v36 }
 0x30b   :  { %v1179_v33 = vpop.f32.mrf.mxu0  ;;  %v858_v39 = vpop.f32.mrf.mxu3 }
 0x30c   :  { %v1192_v37 = vmul.f32 0.2, %v1179_v33  ;;  %v879_v40 = vmax.f32 %v855_v36, %v871_v57  ;;  %v636_v57 = vsel %vm282_vm6, %v2184_v31, 0.0 }
 0x30e   :  { %v1200_v41 = vmax.f32 %v1179_v33, %v1192_v37  ;;  %v340_v33 = vsel %vm282_vm6, %v2055_v9, 0.0  ;;  %v343_v37 = vsel %vm282_vm6, %v2093_v38, 0.0  ;;  %v2267_v4 = vsel %vm1954_vm11, %v879_v40, -1e+30 }
 0x30f   :  { %v349_v38 = vsel %vm282_vm6, %v2108_v6, 0.0  ;;  %v901_v36 = vsel %vm282_vm6, %v2267_v4, -inf }
 0x310   :  { %v2231_v48 = vsel %vm1991_vm2, %v1200_v41, -1e+30 }
 0x311   :  { %v1226_v55 = vsel %vm282_vm6, %v2231_v48, -inf }
 0x312   :  { %1224 = vmax.xlane.f32.xlu2 %v1223_v30  ;;  %1227 = vmax.xlane.f32.xlu0 %v1226_v55  ;;  %v872_v30 = vmul.f32 0.2, %v858_v39 }
 0x313   :  { %v1182_v11 = vpop.f32.mrf.mxu0  ;;  %v860_v32 = vpop.f32.mrf.mxu3 }
 0x314   :  { %v1193_v42 = vmul.f32 0.2, %v1182_v11  ;;  %v873_v29 = vmul.f32 0.2, %v860_v32  ;;  %v880_v7 = vmax.f32 %v858_v39, %v872_v30 }
 0x316   :  { %v1201_v35 = vmax.f32 %v1182_v11, %v1193_v42  ;;  %v881_v60 = vmax.f32 %v860_v32, %v873_v29  ;;  %v2282_v26 = vsel %vm1979_vm14, %v880_v7, -1e+30 }
 0x318   :  { %v2243_v2 = vsel %vm1995_vm3, %v1201_v35, -1e+30  ;;  %v2271_v9 = vsel %vm1991_vm2, %v881_v60, -1e+30 }
 0x319   :  { %v1229_v15 = vsel %vm282_vm6, %v2243_v2, -inf  ;;  %v907_v53 = vsel %vm282_vm6, %v2271_v9, -inf }
 0x31a   :  { %899 = vmax.xlane.f32.xlu2 %v898_v3  ;;  %1230 = vmax.xlane.f32.xlu0 %v1229_v15  ;;  %v904_v15 = vsel %vm282_vm6, %v2282_v26, -inf }
 0x31b   :  { %v1184_v5 = vpop.f32.mrf.mxu0  ;;  %v863_v14 = vpop.f32.mrf.mxu3 }
 0x31c   :  { %v1194_v56 = vmul.f32 0.2, %v1184_v5  ;;  %v874_v32 = vmul.f32 0.2, %v863_v14 }
 0x31e   :  { %v1202_v19 = vmax.f32 %v1184_v5, %v1194_v56 }
 0x320   :  { %v2251_v43 = vsel %vm2024_vm7, %v1202_v19, -1e+30 }
 0x321   :  { %v1232_v21 = vsel %vm282_vm6, %v2251_v43, -inf }
 0x322   :  { %332 = vadd.xlane.f32.xlu2 %v331_v16  ;;  %335 = vadd.xlane.f32.xlu0 %v334_v18  ;;  %v352_v16 = vsel %vm282_vm6, %v2110_v10, 0.0  ;;  %v633_v10 = vsel %vm282_vm6, %v2180_v49, 0.0 }
 0x323   :  { %1233 = vmax.xlane.f32.xlu1 %v1232_v21  ;;  %v865_v41 = vpop.f32.mrf.mxu3 }
 0x324   :  { %v875_v55 = vmul.f32 0.2, %v865_v41 }
 0x326   :  { %v883_v11 = vmax.f32 %v865_v41, %v875_v55 }
 0x328   :  { %v2286_v6 = vsel %vm2024_vm7, %v883_v11, -1e+30 }
 0x329   :  { %v913_v5 = vsel %vm282_vm6, %v2286_v6, -inf }
 0x32a   :  { %341 = vadd.xlane.f32.xlu2 %v340_v33  ;;  %344 = vadd.xlane.f32.xlu0 %v343_v37  ;;  %v630_v33 = vsel %vm282_vm6, %v2151_v63, 0.0 }
 0x32b   :  { %338 = vadd.xlane.f32.xlu1 %v337_v59 }
 0x331   :  { %v593_v42 = vpop.xlane.xlu2 %592 }
 0x332   :  { %350 = vadd.xlane.f32.xlu2 %v349_v38  ;;  %902 = vmax.xlane.f32.xlu0 %v901_v36  ;;  %v603_v35 = vsub.f32 %v2157_v1, %v593_v42  ;;  %v882_v1 = vmax.f32 %v863_v14, %v874_v32 }
 0x333   :  { %908 = vmax.xlane.f32.xlu1 %v907_v53 }
 0x334   :  { %v617_v39 = vmul.f32 1.442695, %v603_v35  ;;  %v2297_v19 = vsel %vm1995_vm3, %v882_v1, -1e+30 }
 0x335   :  { %v910_v28 = vsel %vm282_vm6, %v2297_v19, -inf }
 0x336   :  { %1569 = vpow2.f32 %v617_v39 }
 0x339   :  { %v596_v3 = vpop.xlane.xlu0 %595 }
 0x33a   :  { %v604_v56 = vsub.f32 %v2168_v54, %v596_v3  ;;  %905 = vmax.xlane.f32.xlu0 %v904_v15  ;;  %914 = vmax.xlane.f32.xlu2 %v913_v5  ;;  %v624_v54 = vsel %vm282_vm6, %v2140_v52, 0.0  ;;  %v621_v52 = vsel %vm282_vm6, %v2138_v50, 0.0 }
 0x33b   :  { %347 = vadd.xlane.f32.xlu1 %v346_v8 }
 0x33c   :  { %v619_v58 = vmul.f32 1.442695, %v604_v56  ;;  %v1570_v14 = vpop.eup %1569 }
 0x33d   :  { %v639_v0 = vsel %vm282_vm6, %v1570_v14, 0.0 }
 0x33e   :  { %1571 = vpow2.f32 %v619_v58 }
 0x342   :  { %353 = vadd.xlane.f32.xlu0 %v352_v16  ;;  %625 = vadd.xlane.f32.xlu2 %v624_v54 }
 0x343   :  { %911 = vmax.xlane.f32.xlu1 %v910_v28 }
 0x344   :  { %v1572_v18 = vpop.eup %1571 }
 0x345   :  { %v648_v21 = vpack.c.bf16 %v1572_v18, %v1570_v14  ;;  %v642_v29 = vsel %vm282_vm6, %v1572_v18, 0.0  ;;  %v2339_v18 = vpop.f32.mrf.mxu1 }
 0x347   :  { %1486 = vmatmul.msk.bf16.gmra.mxu1 %vm282_vm6, %v648_v21 }
 0x34a   :  { %628 = vadd.xlane.f32.xlu0 %v627_v27  ;;  %634 = vadd.xlane.f32.xlu2 %v633_v10 }
 0x34b   :  { %622 = vadd.xlane.f32.xlu1 %v621_v52 }
 0x352   :  { %637 = vadd.xlane.f32.xlu0 %v636_v57  ;;  %643 = vadd.xlane.f32.xlu2 %v642_v29 }
 0x353   :  { %631 = vadd.xlane.f32.xlu1 %v630_v33 }
 0x35b   :  { %640 = vadd.xlane.f32.xlu1 %v639_v0 }
 0x35d   :  { %v1213_v49 = vpop.xlane.xlu0 %1212 }
 0x35e   :  { %v1235_v37 = vsub.f32 %v2191_v17, %v1213_v49 }
 0x360   :  { %v1243_v50 = vmul.f32 1.442695, %v1235_v37  ;;  %v2345_v37 = vpop.f32.mrf.mxu1 }
 0x362   :  { %1573 = vpow2.f32 %v1243_v50 }
 0x365   :  { %v1216_v40 = vpop.xlane.xlu1 %1215 }
 0x366   :  { %v1236_v59 = vsub.f32 %v2197_v51, %v1216_v40 }
 0x368   :  { %v1574_v31 = vpop.eup %1573  ;;  %v1245_v60 = vmul.f32 1.442695, %v1236_v59 }
 0x369   :  { %v1259_v41 = vsel %vm282_vm6, %v1574_v31, 0.0 }
 0x36a   :  { %1575 = vpow2.f32 %v1245_v60  ;;  %1260 = vadd.xlane.f32.xlu2 %v1259_v41 }
 0x36d   :  { %v894_v63 = vpop.xlane.xlu1 %893 }
 0x36e   :  { %v916_v53 = vsub.f32 %v2203_v62, %v894_v63 }
 0x370   :  { %v1576_v30 = vpop.eup %1575  ;;  %v924_v35 = vmul.f32 1.442695, %v916_v53 }
 0x371   :  { %v1283_v55 = vpack.c.bf16 %v1576_v30, %v1574_v31  ;;  %v1262_v38 = vsel %vm282_vm6, %v1576_v30, 0.0 }
 0x372   :  { %1263 = vadd.xlane.f32.xlu0 %v1262_v38 }
 0x373   :  { %1515 = vmatmul.msk.bf16.vlgmr.msra.gmra.mxu1 %vm282_vm6, %v1283_v55 }
 0x375   :  { %v1219_v17 = vpop.xlane.xlu1 %1218  ;;  %v1222_v36 = vpop.xlane.xlu2 %1221 }
 0x376   :  { %v1237_v7 = vsub.f32 %v2209_v44, %v1219_v17  ;;  %v1238_v51 = vsub.f32 %v2213_v24, %v1222_v36 }
 0x378   :  { %v1247_v11 = vmul.f32 1.442695, %v1237_v7  ;;  %v1249_v42 = vmul.f32 1.442695, %v1238_v51 }
 0x37a   :  { %1577 = vpow2.f32 %v1247_v11 }
 0x37b   :  { %1579 = vpow2.f32 %v1249_v42 }
 0x37c   :  { %1581 = vpow2.f32 %v924_v35 }
 0x37d   :  { %v897_v32 = vpop.xlane.xlu2 %896 }
 0x37e   :  { %v917_v39 = vsub.f32 %v2221_v25, %v897_v32 }
 0x380   :  { %v1578_v3 = vpop.eup %1577  ;;  %v926_v15 = vmul.f32 1.442695, %v917_v39 }
 0x381   :  { %v1580_v5 = vpop.eup %1579  ;;  %v1265_v56 = vsel %vm282_vm6, %v1578_v3, 0.0 }
 0x382   :  { %1583 = vpow2.f32 %v926_v15  ;;  %1266 = vadd.xlane.f32.xlu1 %v1265_v56  ;;  %v1268_v44 = vsel %vm282_vm6, %v1580_v5, 0.0  ;;  %v1284_v24 = vpack.c.bf16 %v1580_v5, %v1578_v3  ;;  %v2332_v58 = vpop.eup %1581 }
 0x383   :  { %1269 = vadd.xlane.f32.xlu2 %v1268_v44 }
 0x384   :  { %1516 = vmatmul.msk.bf16.gmra.mxu1 %vm282_vm6, %v1284_v24 }
 0x385   :  { %v1225_v62 = vpop.xlane.xlu2 %1224  ;;  %v1228_v8 = vpop.xlane.xlu0 %1227 }
 0x386   :  { %v1239_v1 = vsub.f32 %v2227_v46, %v1225_v62  ;;  %v1240_v25 = vsub.f32 %v2231_v48, %v1228_v8 }
 0x388   :  { %v2334_v16 = vpop.eup %1583  ;;  %v1251_v54 = vmul.f32 1.442695, %v1239_v1  ;;  %v1253_v28 = vmul.f32 1.442695, %v1240_v25 }
 0x389   :  { %v964_v14 = vpack.c.bf16 %v2334_v16, %v2332_v58 }
 0x38a   :  { %1585 = vpow2.f32 %v1251_v54 }
 0x38b   :  { %1587 = vpow2.f32 %v1253_v28  ;;  %1499 = vmatmul.msk.bf16.vlgmr.msra.gmra.mxu2 %vm282_vm6, %v964_v14 }
 0x38d   :  { %v900_v21 = vpop.xlane.xlu2 %899  ;;  %v1231_v27 = vpop.xlane.xlu0 %1230 }
 0x38e   :  { %v1241_v46 = vsub.f32 %v2243_v2, %v1231_v27  ;;  %v918_v11 = vsub.f32 %v2239_v34, %v900_v21 }
 0x390   :  { %v1586_v48 = vpop.eup %1585  ;;  %v1255_v10 = vmul.f32 1.442695, %v1241_v46  ;;  %v928_v39 = vmul.f32 1.442695, %v918_v11 }
 0x391   :  { %v1588_v52 = vpop.eup %1587  ;;  %v1271_v57 = vsel %vm282_vm6, %v1586_v48, 0.0 }
 0x392   :  { %1272 = vadd.xlane.f32.xlu0 %v1271_v57  ;;  %v1274_v29 = vsel %vm282_vm6, %v1588_v52, 0.0  ;;  %v1285_v33 = vpack.c.bf16 %v1588_v52, %v1586_v48  ;;  %1589 = vpow2.f32 %v1255_v10 }
 0x393   :  { %1275 = vadd.xlane.f32.xlu1 %v1274_v29 }
 0x394   :  { %1517 = vmatmul.msk.bf16.gmra.mxu1 %vm282_vm6, %v1285_v33 }
 0x395   :  { %v333_v0 = vpop.xlane.xlu2 %332  ;;  %v336_v49 = vpop.xlane.xlu0 %335 }
 0x396   :  { %1591 = vrcp.f32 %v333_v0  ;;  %v1234_v50 = vpop.xlane.xlu1 %1233 }
 0x397   :  { %v1242_v2 = vsub.f32 %v2251_v43, %v1234_v50  ;;  %1593 = vrcp.f32 %v336_v49  ;;  %v2351_v43 = vpop.f32.mrf.mxu1 }
 0x398   :  { %v1590_v40 = vpop.eup %1589 }
 0x399   :  { %v1257_v59 = vmul.f32 1.442695, %v1242_v2  ;;  %v1277_v31 = vsel %vm282_vm6, %v1590_v40, 0.0 }
 0x39a   :  { %1278 = vadd.xlane.f32.xlu2 %v1277_v31 }
 0x39b   :  { %1595 = vpow2.f32 %v1257_v59 }
 0x39c   :  { %v1592_v60 = vpop.eup %1591 }
 0x39d   :  { %v1594_v41 = vpop.eup %1593  ;;  %v408_v63 = vmul.f32 %v1592_v60, %v2136_v45  ;;  %v342_v30 = vpop.xlane.xlu2 %341 }
 0x39e   :  { %v345_v55 = vpop.xlane.xlu0 %344  ;;  %v409_v38 = vmul.f32 %v1594_v41, %v2145_v23  ;;  %1597 = vrcp.f32 %v342_v30  ;;  %v339_v17 = vpop.xlane.xlu1 %338 }
 0x39f   :  { %v424_v36 = vmin.f32 %v408_v63, 0.0  ;;  %1599 = vrcp.f32 %v339_v17  ;;  %v2363_v14 = vpop.f32.mrf.mxu1  ;;  %vm416_vm5 = vcmp.gt.f32.partialorder %v408_v63, 0.0 }
 0x3a0   :  { %v425_v7 = vmin.f32 %v409_v38, 0.0  ;;  %1601 = vrcp.f32 %v345_v55  ;;  %vm417_vm8 = vcmp.gt.f32.partialorder %v409_v38, 0.0 }
 0x3a1   :  { %v1596_v51 = vpop.eup %1595  ;;  %v432_v42 = vmul.f32 1.442695, %v424_v36 }
 0x3a2   :  { %v1280_v53 = vsel %vm282_vm6, %v1596_v51, 0.0  ;;  %v1286_v35 = vpack.c.bf16 %v1596_v51, %v1590_v40  ;;  %v434_v45 = vmul.f32 1.442695, %v425_v7 }
 0x3a3   :  { %1281 = vadd.xlane.f32.xlu0 %v1280_v53  ;;  %1603 = vpow2.f32 %v432_v42 }
 0x3a4   :  { %v1598_v32 = vpop.eup %1597  ;;  %1518 = vmatmul.msk.bf16.gmra.mxu1 %vm282_vm6, %v1286_v35  ;;  %1605 = vpow2.f32 %v434_v45 }
 0x3a5   :  { %v1600_v23 = vpop.eup %1599  ;;  %v2357_v3 = vmul.f32 %v1598_v32, %v2164_v47  ;;  %v351_v15 = vpop.xlane.xlu2 %350 }
 0x3a6   :  { %v903_v5 = vpop.xlane.xlu0 %902  ;;  %v1602_v56 = vpop.eup %1601  ;;  %v410_v34 = vmul.f32 %v1600_v23, %v2149_v61  ;;  %1607 = vrcp.f32 %v351_v15 }
 0x3a7   :  { %v909_v44 = vpop.xlane.xlu1 %908  ;;  %v919_v24 = vsub.f32 %v2267_v4, %v903_v5  ;;  %v427_v62 = vmin.f32 %v2357_v3, 0.0  ;;  %v412_v8 = vmul.f32 %v1602_v56, %v2172_v12  ;;  %1609 = vpow2.f32 %v928_v39  ;;  %v2377_v31 = vpop.f32.mrf.mxu1 }
 0x3a8   :  { %v426_v1 = vmin.f32 %v410_v34, 0.0  ;;  %v921_v60 = vsub.f32 %v2271_v9, %v909_v44  ;;  %vm418_vm9 = vcmp.gt.f32.partialorder %v410_v34, 0.0  ;;  %vm419_vm11 = vcmp.gt.f32.partialorder %v2357_v3, 0.0 }
 0x3a9   :  { %v930_v25 = vmul.f32 1.442695, %v919_v24  ;;  %v1604_v54 = vpop.eup %1603  ;;  %v428_v28 = vmin.f32 %v412_v8, 0.0  ;;  %v438_v61 = vmul.f32 1.442695, %v427_v62  ;;  %vm420_vm10 = vcmp.gt.f32.partialorder %v412_v8, 0.0 }
 0x3aa   :  { %v1606_v47 = vpop.eup %1605  ;;  %v1471_v21 = vadd.f32 -1.0, %v1604_v54  ;;  %v436_v27 = vmul.f32 1.442695, %v426_v1  ;;  %v934_v11 = vmul.f32 1.442695, %v921_v60 }
 0x3ab   :  { %1611 = vpow2.f32 %v930_v25  ;;  %v1472_v46 = vadd.f32 -1.0, %v1606_v47  ;;  %v440_v48 = vmul.f32 1.442695, %v428_v28 }
 0x3ac   :  { %v1608_v4 = vpop.eup %1607  ;;  %v456_v10 = vsel %vm416_vm5, %v408_v63, %v1471_v21  ;;  %1613 = vpow2.f32 %v436_v27 }
 0x3ad   :  { %v414_v12 = vmul.f32 %v1608_v4, %v2178_v20  ;;  %v2366_v52 = vpop.xlane.xlu2 %914  ;;  %v457_v29 = vsel %vm417_vm8, %v409_v38, %v1472_v46  ;;  %464 = vst.msk [vmem:[#allocation2] sm:$0xff] %vm146_vm1, %v456_v10  ;;  %1615 = vpow2.f32 %v440_v48  ;;  %v2370_v0 = vpop.eup %1609 }
 0x3ae   :  { %v906_v57 = vpop.xlane.xlu0 %905  ;;  %465 = vst.msk [vmem:[#allocation2 + $0x8] sm:$0xff] %vm146_vm1, %v457_v29  ;;  %1617 = vpow2.f32 %v438_v61  ;;  %v923_v27 = vsub.f32 %v2286_v6, %v2366_v52 }
 0x3af   :  { %v348_v33 = vpop.xlane.xlu1 %347  ;;  %v430_v49 = vmin.f32 %v414_v12, 0.0  ;;  %v920_v2 = vsub.f32 %v2282_v26, %v906_v57  ;;  %vm422_vm12 = vcmp.gt.f32.partialorder %v414_v12, 0.0 }
 0x3b0   :  { %1619 = vrcp.f32 %v348_v33  ;;  %v938_v6 = vmul.f32 1.442695, %v923_v27 }
 0x3b1   :  { %v2372_v50 = vpop.eup %1611  ;;  %v444_v40 = vmul.f32 1.442695, %v430_v49  ;;  %v932_v55 = vmul.f32 1.442695, %v920_v2 }
 0x3b2   :  { %v965_v20 = vpack.c.bf16 %v2372_v50, %v2370_v0  ;;  %v1614_v59 = vpop.eup %1613 }
 0x3b3   :  { %v1616_v41 = vpop.eup %1615  ;;  %v1473_v63 = vadd.f32 -1.0, %v1614_v59  ;;  %1621 = vpow2.f32 %v444_v40 }
 0x3b4   :  { %1500 = vmatmul.msk.bf16.gmra.mxu2 %vm282_vm6, %v965_v20  ;;  %v1618_v30 = vpop.eup %1617  ;;  %v1475_v38 = vadd.f32 -1.0, %v1616_v41 }
 0x3b5   :  { %v626_v26 = vpop.xlane.xlu2 %625  ;;  %v458_v7 = vsel %vm418_vm9, %v410_v34, %v1473_v63  ;;  %v1474_v51 = vadd.f32 -1.0, %v1618_v30 }
 0x3b6   :  { %v1620_v17 = vpop.eup %1619  ;;  %v354_v36 = vpop.xlane.xlu0 %353  ;;  %1623 = vrcp.f32 %v626_v26  ;;  %466 = vst.msk [vmem:[#allocation2 + $0x10] sm:$0xff] %vm146_vm1, %v458_v7  ;;  %v460_v53 = vsel %vm420_vm10, %v412_v8, %v1475_v38 }
 0x3b7   :  { %v413_v9 = vmul.f32 %v1620_v17, %v2174_v13  ;;  %v912_v42 = vpop.xlane.xlu1 %911  ;;  %1625 = vrcp.f32 %v354_v36  ;;  %468 = vst.msk [vmem:[#allocation2 + $0x20] sm:$0xff] %vm146_vm1, %v460_v53  ;;  %v459_v35 = vsel %vm419_vm11, %v2357_v3, %v1474_v51  ;;  %v2387_v13 = vpop.f32.mrf.mxu1  ;;  %vm790_vm11 = vcmask 261248  }
 0x3b8   :  { %1627 = vpow2.f32 %v932_v55  ;;  %467 = vst.msk [vmem:[#allocation2 + $0x18] sm:$0xff] %vm146_vm1, %v459_v35  ;;  %v922_v56 = vsub.f32 %v2297_v19, %v912_v42 }
 0x3b9   :  { %v429_v45 = vmin.f32 %v413_v9, 0.0  ;;  %v1622_v32 = vpop.eup %1621  ;;  %1629 = vpow2.f32 %v934_v11  ;;  %vm421_vm13 = vcmp.gt.f32.partialorder %v413_v9, 0.0 }
 0x3ba   :  { %v1477_v39 = vadd.f32 -1.0, %v1622_v32  ;;  %v936_v19 = vmul.f32 1.442695, %v922_v56 }
 0x3bb   :  { %v442_v23 = vmul.f32 1.442695, %v429_v45 }
 0x3bc   :  { %v1624_v15 = vpop.eup %1623  ;;  %v462_v24 = vsel %vm422_vm12, %v414_v12, %v1477_v39 }
 0x3bd   :  { %1631 = vpow2.f32 %v442_v23  ;;  %v1626_v5 = vpop.eup %1625  ;;  %v635_v34 = vpop.xlane.xlu2 %634  ;;  %v703_v3 = vmul.f32 %v1624_v15, %v2345_v37  ;;  %470 = vst.msk [vmem:[#allocation2 + $0x30] sm:$0xff] %vm146_vm1, %v462_v24 }
 0x3be   :  { %v629_v44 = vpop.xlane.xlu0 %628  ;;  %v2391_v62 = vpop.eup %1627  ;;  %v415_v8 = vmul.f32 %v1626_v5, %v2182_v22  ;;  %1633 = vrcp.f32 %v635_v34 }
 0x3bf   :  { %v623_v1 = vpop.xlane.xlu1 %622  ;;  %v719_v25 = vmin.f32 %v703_v3, 0.0  ;;  %v2395_v54 = vpop.eup %1629  ;;  %vm711_vm14 = vcmp.gt.f32.partialorder %v703_v3, 0.0 }
 0x3c0   :  { %1635 = vrcp.f32 %v623_v1  ;;  %v431_v28 = vmin.f32 %v415_v8, 0.0  ;;  %v966_v47 = vpack.c.bf16 %v2395_v54, %v2391_v62  ;;  %vm423_vm15 = vcmp.gt.f32.partialorder %v415_v8, 0.0 }
 0x3c1   :  { %1637 = vrcp.f32 %v629_v44  ;;  %v728_v37 = vmul.f32 1.442695, %v719_v25 }
 0x3c2   :  { %v446_v22 = vmul.f32 1.442695, %v431_v28 }
 0x3c3   :  { %v1632_v21 = vpop.eup %1631  ;;  %1639 = vpow2.f32 %v728_v37 }
 0x3c4   :  { %1501 = vmatmul.msk.bf16.gmra.mxu2 %vm282_vm6, %v966_v47  ;;  %v1476_v61 = vadd.f32 -1.0, %v1632_v21  ;;  %v1634_v46 = vpop.eup %1633  ;;  %v2402_v48 = vpop.f32.mrf.mxu1  ;;  %1641 = vpow2.f32 %v446_v22 }
 0x3c5   :  { %1643 = vpow2.f32 %v936_v19  ;;  %v644_v10 = vpop.xlane.xlu2 %643  ;;  %v2405_v57 = vmul.f32 %v1634_v46, %v2377_v31 }
 0x3c6   :  { %v1636_v4 = vpop.eup %1635  ;;  %v638_v12 = vpop.xlane.xlu0 %637  ;;  %v461_v29 = vsel %vm421_vm13, %v413_v9, %v1476_v61  ;;  %1645 = vrcp.f32 %v644_v10 }
 0x3c7   :  { %v1638_v33 = vpop.eup %1637  ;;  %v632_v52 = vpop.xlane.xlu1 %631  ;;  %v702_v49 = vmul.f32 %v1636_v4, %v2339_v18  ;;  %469 = vst.msk [vmem:[#allocation2 + $0x28] sm:$0xff] %vm146_vm1, %v461_v29  ;;  %v722_v40 = vmin.f32 %v2405_v57, 0.0  ;;  %vm714_vm2 = vcmp.gt.f32.partialorder %v2405_v57, 0.0 }
 0x3c8   :  { %1647 = vrcp.f32 %v632_v52  ;;  %v704_v2 = vmul.f32 %v1638_v33, %v2351_v43 }
 0x3c9   :  { %1649 = vrcp.f32 %v638_v12  ;;  %v718_v20 = vmin.f32 %v702_v49, 0.0  ;;  %v1640_v59 = vpop.eup %1639  ;;  %v734_v43 = vmul.f32 1.442695, %v722_v40 }
 0x3ca   :  { %v720_v60 = vmin.f32 %v704_v2, 0.0  ;;  %v1642_v31 = vpop.eup %1641  ;;  %1651 = vpow2.f32 %v938_v6  ;;  %v1488_v41 = vadd.f32 -1.0, %v1640_v59  ;;  %vm712_vm0 = vcmp.gt.f32.partialorder %v704_v2, 0.0 }
 0x3cb   :  { %v726_v63 = vmul.f32 1.442695, %v718_v20  ;;  %v2411_v30 = vpop.eup %1643  ;;  %v1478_v18 = vadd.f32 -1.0, %v1642_v31 }
 0x3cc   :  { %v730_v55 = vmul.f32 1.442695, %v720_v60  ;;  %v1646_v38 = vpop.eup %1645  ;;  %v691_v17 = vpop.f32.mrf.mxu1  ;;  %v751_v26 = vsel %vm711_vm14, %v703_v3, %v1488_v41 }
 0x3cd   :  { %1653 = vpow2.f32 %v726_v63  ;;  %v709_v7 = vmul.f32 %v1646_v38, %v691_v17  ;;  %768 = vrot.lane.b32.xlu2 %v751_v26, %s1763_s3  ;;  %v463_v51 = vsel %vm423_vm15, %v415_v8, %v1478_v18 }
 0x3ce   :  { %v1648_v36 = vpop.eup %1647  ;;  %1655 = vpow2.f32 %v730_v55  ;;  %471 = vst.msk [vmem:[#allocation2 + $0x38] sm:$0xff] %vm146_vm1, %v463_v51  ;;  %vm710_vm1 = vcmp.gt.f32.partialorder %v702_v49, 0.0 }
 0x3cf   :  { %v1650_v11 = vpop.eup %1649  ;;  %v641_v9 = vpop.xlane.xlu1 %640  ;;  %v705_v42 = vmul.f32 %v1648_v36, %v2363_v14  ;;  %v725_v45 = vmin.f32 %v709_v7, 0.0  ;;  %vm717_vm7 = vcmp.gt.f32.partialorder %v709_v7, 0.0 }
 0x3d0   :  { %1657 = vrcp.f32 %v641_v9  ;;  %v707_v53 = vmul.f32 %v1650_v11, %v2387_v13  ;;  %v2417_v35 = vpop.eup %1651 }
 0x3d1   :  { %1659 = vpow2.f32 %v734_v43  ;;  %v721_v32 = vmin.f32 %v705_v42, 0.0  ;;  %v967_v23 = vpack.c.bf16 %v2417_v35, %v2411_v30  ;;  %v740_v44 = vmul.f32 1.442695, %v725_v45 }
 0x3d2   :  { %v723_v39 = vmin.f32 %v707_v53, 0.0  ;;  %vm713_vm3 = vcmp.gt.f32.partialorder %v705_v42, 0.0  ;;  %vm715_vm4 = vcmp.gt.f32.partialorder %v707_v53, 0.0 }
 0x3d3   :  { %v1654_v15 = vpop.eup %1653  ;;  %v732_v5 = vmul.f32 1.442695, %v721_v32 }
 0x3d4   :  { %v1656_v56 = vpop.eup %1655  ;;  %1502 = vmatmul.msk.bf16.gmra.mxu2 %vm282_vm6, %v967_v23  ;;  %v1487_v14 = vadd.f32 -1.0, %v1654_v15  ;;  %v736_v34 = vmul.f32 1.442695, %v723_v39 }
 0x3d5   :  { %v1489_v3 = vadd.f32 -1.0, %v1656_v56  ;;  %1661 = vpow2.f32 %v732_v5 }
 0x3d6   :  { %v1658_v13 = vpop.eup %1657  ;;  %v750_v24 = vsel %vm710_vm1, %v702_v49, %v1487_v14  ;;  %1663 = vpow2.f32 %v736_v34  ;;  %v943_v14 = vsel %vm282_vm6, %v2334_v16, 0.0  ;;  %v955_v16 = vsel %vm282_vm6, %v2395_v54, 0.0 }
 0x3d7   :  { %v1660_v8 = vpop.eup %1659  ;;  %766 = vrot.lane.b32.xlu1 %v750_v24, %s1763_s3  ;;  %v752_v1 = vsel %vm712_vm0, %v704_v2, %v1489_v3  ;;  %v708_v25 = vmul.f32 %v1658_v13, %v2402_v48  ;;  %1665 = vpow2.f32 %v740_v44  ;;  %v946_v44 = vsel %vm282_vm6, %v2370_v0, 0.0 }
 0x3d8   :  { %770 = vrot.lane.b32.xlu0 %v752_v1, %s1763_s3  ;;  %v1491_v19 = vadd.f32 -1.0, %v1660_v8  ;;  %v952_v3 = vsel %vm282_vm6, %v2391_v62, 0.0  ;;  %v961_v0 = vsel %vm282_vm6, %v2417_v35, 0.0 }
 0x3d9   :  { %v724_v28 = vmin.f32 %v708_v25, 0.0  ;;  %vm716_vm5 = vcmp.gt.f32.partialorder %v708_v25, 0.0 }
 0x3da   :  { %v754_v61 = vsel %vm714_vm2, %v2405_v57, %v1491_v19 }
 0x3db   :  { %v1662_v47 = vpop.eup %1661  ;;  %v738_v37 = vmul.f32 1.442695, %v724_v28 }
 0x3dc   :  { %v1664_v21 = vpop.eup %1663  ;;  %v1490_v27 = vadd.f32 -1.0, %v1662_v47 }
 0x3dd   :  { %v1492_v22 = vadd.f32 -1.0, %v1664_v21  ;;  %1667 = vpow2.f32 %v738_v37  ;;  %v1666_v4 = vpop.eup %1665  ;;  %v1261_v57 = vpop.xlane.xlu2 %1260 }
 0x3de   :  { %v753_v46 = vsel %vm713_vm3, %v705_v42, %v1490_v27  ;;  %v1494_v10 = vadd.f32 -1.0, %v1666_v4  ;;  %1669 = vrcp.f32 %v1261_v57  ;;  %v949_v4 = vsel %vm282_vm6, %v2372_v50, 0.0 }
 0x3df   :  { %774 = vrot.lane.b32.xlu1 %v754_v61, %s1763_s3  ;;  %v755_v48 = vsel %vm715_vm4, %v707_v53, %v1492_v22  ;;  %v940_v53 = vsel %vm282_vm6, %v2332_v58, 0.0 }
 0x3e0   :  { %772 = vrot.lane.b32.xlu0 %v753_v46, %s1763_s3  ;;  %776 = vrot.lane.b32.xlu2 %v755_v48, %s1763_s3  ;;  %v757_v33 = vsel %vm717_vm7, %v709_v7, %v1494_v10 }
 0x3e3   :  { %v1668_v12 = vpop.eup %1667 }
 0x3e4   :  { %v1493_v29 = vadd.f32 -1.0, %v1668_v12  ;;  %v1670_v49 = vpop.eup %1669 }
 0x3e5   :  { %v1264_v52 = vpop.xlane.xlu0 %1263 }
 0x3e6   :  { %v756_v6 = vsel %vm716_vm5, %v708_v25, %v1493_v29  ;;  %1671 = vrcp.f32 %v1264_v52 }
 0x3e7   :  { %780 = vrot.lane.b32.xlu1 %v757_v33, %s1763_s3 }
 0x3e8   :  { %778 = vrot.lane.b32.xlu0 %v756_v6, %s1763_s3  ;;  %v958_v6 = vsel %vm282_vm6, %v2411_v30, 0.0 }
 0x3ec   :  { %v1672_v60 = vpop.eup %1671 }
 0x3f0   :  { %v1312_v2 = vpop.f32.mrf.mxu1 }
 0x3f1   :  { %v1340_v20 = vmul.f32 %v1670_v49, %v1312_v2 }
 0x3f3   :  { %v1356_v40 = vmin.f32 %v1340_v20, 0.0  ;;  %vm1348_vm8 = vcmp.gt.f32.partialorder %v1340_v20, 0.0 }
 0x3f5   :  { %v1364_v59 = vmul.f32 1.442695, %v1356_v40  ;;  %v1267_v26 = vpop.xlane.xlu1 %1266 }
 0x3f6   :  { %v1270_v32 = vpop.xlane.xlu2 %1269 }
 0x3f7   :  { %1673 = vpow2.f32 %v1364_v59 }
 0x3f8   :  { %v1314_v31 = vpop.f32.mrf.mxu1 }
 0x3f9   :  { %v1341_v41 = vmul.f32 %v1672_v60, %v1314_v31 }
 0x3fb   :  { %v1357_v63 = vmin.f32 %v1341_v41, 0.0  ;;  %vm1349_vm9 = vcmp.gt.f32.partialorder %v1341_v41, 0.0 }
 0x3fd   :  { %v1674_v55 = vpop.eup %1673  ;;  %v1366_v18 = vmul.f32 1.442695, %v1357_v63 }
 0x3fe   :  { %v1519_v38 = vadd.f32 -1.0, %v1674_v55 }
 0x3ff   :  { %1675 = vpow2.f32 %v1366_v18 }
 0x400   :  { %v1388_v17 = vsel %vm1348_vm8, %v1340_v20, %v1519_v38  ;;  %1677 = vrcp.f32 %v1267_v26 }
 0x401   :  { %1404 = vrot.lane.b32.xlu1 %v1388_v17, %s1764_s6  ;;  %v1317_v7 = vpop.f32.mrf.mxu1 }
 0x405   :  { %v1676_v43 = vpop.eup %1675  ;;  %v1273_v34 = vpop.xlane.xlu0 %1272 }
 0x406   :  { %v1520_v36 = vadd.f32 -1.0, %v1676_v43  ;;  %v1678_v11 = vpop.eup %1677  ;;  %v2451_v47 = vpop.xlane.xlu1 %1275 }
 0x407   :  { %v1342_v9 = vmul.f32 %v1678_v11, %v1317_v7 }
 0x408   :  { %v1389_v51 = vsel %vm1349_vm9, %v1341_v41, %v1520_v36  ;;  %vm1109_vm9 = vcmask 392448  }
 0x409   :  { %1406 = vrot.lane.b32.xlu2 %v1389_v51, %s1764_s6  ;;  %v1358_v42 = vmin.f32 %v1342_v9, 0.0  ;;  %vm1350_vm10 = vcmp.gt.f32.partialorder %v1342_v9, 0.0  ;;  %v1319_v58 = vpop.f32.mrf.mxu1 }
 0x40b   :  { %v1368_v45 = vmul.f32 1.442695, %v1358_v42 }
 0x40d   :  { %1679 = vpow2.f32 %v1368_v45  ;;  %v2436_v39 = vpop.xlane.xlu2 %1278 }
 0x40e   :  { %1681 = vrcp.f32 %v1273_v34  ;;  %v993_v52 = vpop.f32.mrf.mxu2 }
 0x40f   :  { %1683 = vrcp.f32 %v1270_v32 }
 0x411   :  { %v1322_v13 = vpop.f32.mrf.mxu1 }
 0x412   :  { %941 = vadd.xlane.f32.xlu0 %v940_v53 }
 0x413   :  { %v1680_v23 = vpop.eup %1679 }
 0x414   :  { %v1521_v15 = vadd.f32 -1.0, %v1680_v23  ;;  %v1682_v24 = vpop.eup %1681 }
 0x415   :  { %v1344_v8 = vmul.f32 %v1682_v24, %v1322_v13  ;;  %v1684_v1 = vpop.eup %1683 }
 0x416   :  { %v1390_v5 = vsel %vm1350_vm10, %v1342_v9, %v1521_v15  ;;  %v1343_v28 = vmul.f32 %v1684_v1, %v1319_v58  ;;  %v2453_v21 = vpop.xlane.xlu0 %1281  ;;  %v995_v49 = vpop.f32.mrf.mxu2  ;;  %vm1428_vm10 = vcmask 523648  }
 0x417   :  { %v1360_v19 = vmin.f32 %v1344_v8, 0.0  ;;  %vm1352_vm12 = vcmp.gt.f32.partialorder %v1344_v8, 0.0 }
 0x418   :  { %v1359_v62 = vmin.f32 %v1343_v28, 0.0  ;;  %vm1351_vm13 = vcmp.gt.f32.partialorder %v1343_v28, 0.0 }
 0x419   :  { %v1372_v37 = vmul.f32 1.442695, %v1360_v19  ;;  %v1324_v51 = vpop.f32.mrf.mxu1 }
 0x41a   :  { %v1370_v27 = vmul.f32 1.442695, %v1359_v62 }
 0x41b   :  { %1685 = vpow2.f32 %v1372_v37 }
 0x41c   :  { %1687 = vpow2.f32 %v1370_v27 }
 0x421   :  { %v1686_v61 = vpop.eup %1685  ;;  %v1327_v34 = vpop.f32.mrf.mxu1 }
 0x422   :  { %v1688_v46 = vpop.eup %1687  ;;  %v1523_v35 = vadd.f32 -1.0, %v1686_v61 }
 0x423   :  { %v1522_v48 = vadd.f32 -1.0, %v1688_v46 }
 0x424   :  { %v1392_v29 = vsel %vm1352_vm12, %v1344_v8, %v1523_v35 }
 0x425   :  { %v1391_v33 = vsel %vm1351_vm13, %v1343_v28, %v1522_v48 }
 0x426   :  { %1408 = vrot.lane.b32.xlu0 %v1390_v5, %s1764_s6 }
 0x427   :  { %v769_v56 = vpop.permute.xlu2 %768 }
 0x428   :  { %792 = vst.msk [vmem:[#allocation2 + $0x8] sm:$0xff] %vm790_vm11, %v769_v56 }
 0x42b   :  { %944 = vadd.xlane.f32.xlu1 %v943_v14 }
 0x432   :  { %947 = vadd.xlane.f32.xlu2 %v946_v44 }
 0x433   :  { %953 = vadd.xlane.f32.xlu1 %v952_v3 }
 0x437   :  { %v998_v2 = vpop.f32.mrf.mxu2 }
 0x43a   :  { %v777_v25 = vpop.permute.xlu2 %776  ;;  %956 = vadd.xlane.f32.xlu2 %v955_v16 }
 0x43b   :  { %796 = vst.msk [vmem:[#allocation2 + $0x28] sm:$0xff] %vm790_vm11, %v777_v25  ;;  %962 = vadd.xlane.f32.xlu1 %v961_v0 }
 0x43f   :  { %v2467_v60 = vpop.f32.mrf.mxu2 }
 0x447   :  { %v1003_v63 = vpop.f32.mrf.mxu2 }
 0x449   :  { %v767_v22 = vpop.permute.xlu1 %766 }
 0x44a   :  { %791 = vst.msk [vmem:[#allocation2] sm:$0xff] %vm790_vm11, %v767_v22  ;;  %v771_v54 = vpop.permute.xlu0 %770 }
 0x44b   :  { %793 = vst.msk [vmem:[#allocation2 + $0x10] sm:$0xff] %vm790_vm11, %v771_v54 }
 0x44f   :  { %v1005_v43 = vpop.f32.mrf.mxu2 }
 0x450   :  { %950 = vadd.xlane.f32.xlu0 %v949_v4 }
 0x451   :  { %v775_v10 = vpop.permute.xlu1 %774 }
 0x452   :  { %795 = vst.msk [vmem:[#allocation2 + $0x20] sm:$0xff] %vm790_vm11, %v775_v10  ;;  %v773_v12 = vpop.permute.xlu0 %772  ;;  %1412 = vrot.lane.b32.xlu2 %v1392_v29, %s1764_s6 }
 0x453   :  { %794 = vst.msk [vmem:[#allocation2 + $0x18] sm:$0xff] %vm790_vm11, %v773_v12 }
 0x454   :  { %1410 = vrot.lane.b32.xlu1 %v1391_v33, %s1764_s6 }
 0x457   :  { %v2475_v45 = vpop.f32.mrf.mxu2 }
 0x458   :  { %959 = vadd.xlane.f32.xlu0 %v958_v6 }
 0x459   :  { %v781_v50 = vpop.permute.xlu1 %780 }
 0x45a   :  { %798 = vst.msk [vmem:[#allocation2 + $0x38] sm:$0xff] %vm790_vm11, %v781_v50  ;;  %v779_v57 = vpop.permute.xlu0 %778 }
 0x45b   :  { %797 = vst.msk [vmem:[#allocation2 + $0x30] sm:$0xff] %vm790_vm11, %v779_v57 }
 0x45f   :  { %v1010_v19 = vpop.f32.mrf.mxu2 }
 0x463   :  { %v2472_v17 = vpop.permute.xlu2 %1406 }
 0x473   :  { %v2469_v30 = vpop.permute.xlu1 %1404 }
 0x485   :  { %v942_v20 = vpop.xlane.xlu0 %941 }
 0x486   :  { %1689 = vrcp.f32 %v942_v20 }
 0x48c   :  { %v1690_v40 = vpop.eup %1689 }
 0x48d   :  { %v1021_v59 = vmul.f32 %v1690_v40, %v993_v52 }
 0x48f   :  { %v1037_v31 = vmin.f32 %v1021_v59, 0.0  ;;  %vm1029_vm6 = vcmp.gt.f32.partialorder %v1021_v59, 0.0 }
 0x491   :  { %v1045_v41 = vmul.f32 1.442695, %v1037_v31 }
 0x493   :  { %1691 = vpow2.f32 %v1045_v41 }
 0x498   :  { %v2479_v48 = vpop.permute.xlu0 %1408 }
 0x499   :  { %v1692_v55 = vpop.eup %1691 }
 0x49a   :  { %v1503_v18 = vadd.f32 -1.0, %v1692_v55 }
 0x49c   :  { %v1069_v38 = vsel %vm1029_vm6, %v1021_v59, %v1503_v18 }
 0x49d   :  { %1085 = vrot.lane.b32.xlu2 %v1069_v38, %s1765_s7 }
 0x49e   :  { %v945_v26 = vpop.xlane.xlu1 %944 }
 0x49f   :  { %1693 = vrcp.f32 %v945_v26 }
 0x4a5   :  { %v1694_v36 = vpop.eup %1693  ;;  %v948_v7 = vpop.xlane.xlu2 %947 }
 0x4a6   :  { %1695 = vrcp.f32 %v948_v7  ;;  %v954_v11 = vpop.xlane.xlu1 %953  ;;  %v1022_v9 = vmul.f32 %v1694_v36, %v995_v49 }
 0x4a7   :  { %1697 = vrcp.f32 %v954_v11 }
 0x4a8   :  { %v1038_v42 = vmin.f32 %v1022_v9, 0.0  ;;  %1699 = vrcp.f32 %v2436_v39  ;;  %vm1030_vm14 = vcmp.gt.f32.partialorder %v1022_v9, 0.0 }
 0x4aa   :  { %v1047_v53 = vmul.f32 1.442695, %v1038_v42 }
 0x4ac   :  { %v1696_v32 = vpop.eup %1695  ;;  %1701 = vpow2.f32 %v1047_v53 }
 0x4ad   :  { %v1698_v23 = vpop.eup %1697  ;;  %1703 = vrcp.f32 %v2451_v47  ;;  %v957_v15 = vpop.xlane.xlu2 %956  ;;  %v1023_v5 = vmul.f32 %v1696_v32, %v998_v2 }
 0x4ae   :  { %1705 = vrcp.f32 %v957_v15  ;;  %v963_v56 = vpop.xlane.xlu1 %962  ;;  %v1025_v14 = vmul.f32 %v1698_v23, %v1003_v63  ;;  %v1700_v3 = vpop.eup %1699 }
 0x4af   :  { %1707 = vrcp.f32 %v963_v56  ;;  %v1039_v58 = vmin.f32 %v1023_v5, 0.0  ;;  %v1346_v1 = vmul.f32 %v1700_v3, %v1327_v34  ;;  %vm1031_vm15 = vcmp.gt.f32.partialorder %v1023_v5, 0.0 }
 0x4b0   :  { %v1041_v44 = vmin.f32 %v1025_v14, 0.0  ;;  %vm1033_vm1 = vcmp.gt.f32.partialorder %v1025_v14, 0.0 }
 0x4b1   :  { %v1049_v13 = vmul.f32 1.442695, %v1039_v58  ;;  %v1362_v27 = vmin.f32 %v1346_v1, 0.0  ;;  %vm1354_vm3 = vcmp.gt.f32.partialorder %v1346_v1, 0.0 }
 0x4b2   :  { %v1702_v24 = vpop.eup %1701  ;;  %v1053_v39 = vmul.f32 1.442695, %v1041_v44 }
 0x4b3   :  { %v1704_v8 = vpop.eup %1703  ;;  %v1504_v25 = vadd.f32 -1.0, %v1702_v24  ;;  %1709 = vpow2.f32 %v1049_v13  ;;  %v1376_v29 = vmul.f32 1.442695, %v1362_v27 }
 0x4b4   :  { %v1706_v16 = vpop.eup %1705  ;;  %v1345_v28 = vmul.f32 %v1704_v8, %v1324_v51  ;;  %1711 = vpow2.f32 %v1053_v39  ;;  %v1329_v51 = vpop.f32.mrf.mxu1 }
 0x4b5   :  { %v1708_v0 = vpop.eup %1707  ;;  %v1070_v62 = vsel %vm1030_vm14, %v1022_v9, %v1504_v25  ;;  %v1026_v47 = vmul.f32 %v1706_v16, %v1005_v43  ;;  %v1413_v39 = vpop.permute.xlu2 %1412 }
 0x4b6   :  { %1087 = vrot.lane.b32.xlu0 %v1070_v62, %s1765_s7  ;;  %v1028_v37 = vmul.f32 %v1708_v0, %v1010_v19  ;;  %v1361_v54 = vmin.f32 %v1345_v28, 0.0  ;;  %vm1353_vm4 = vcmp.gt.f32.partialorder %v1345_v28, 0.0 }
 0x4b7   :  { %v1042_v22 = vmin.f32 %v1026_v47, 0.0  ;;  %vm1034_vm0 = vcmp.gt.f32.partialorder %v1026_v47, 0.0 }
 0x4b8   :  { %v1044_v61 = vmin.f32 %v1028_v37, 0.0  ;;  %v1374_v6 = vmul.f32 1.442695, %v1361_v54  ;;  %vm1036_vm2 = vcmp.gt.f32.partialorder %v1028_v37, 0.0 }
 0x4b9   :  { %v1710_v46 = vpop.eup %1709  ;;  %v1055_v35 = vmul.f32 1.442695, %v1042_v22 }
 0x4ba   :  { %v1712_v4 = vpop.eup %1711  ;;  %v1505_v10 = vadd.f32 -1.0, %v1710_v46  ;;  %v1059_v12 = vmul.f32 1.442695, %v1044_v61 }
 0x4bb   :  { %v1507_v33 = vadd.f32 -1.0, %v1712_v4  ;;  %1713 = vpow2.f32 %v1055_v35 }
 0x4bc   :  { %v1071_v50 = vsel %vm1031_vm15, %v1023_v5, %v1505_v10  ;;  %1715 = vpow2.f32 %v1059_v12 }
 0x4bd   :  { %1089 = vrot.lane.b32.xlu1 %v1071_v50, %s1765_s7  ;;  %v1073_v57 = vsel %vm1033_vm1, %v1025_v14, %v1507_v33  ;;  %1717 = vpow2.f32 %v1376_v29 }
 0x4be   :  { %1093 = vrot.lane.b32.xlu0 %v1073_v57, %s1765_s7  ;;  %1719 = vpow2.f32 %v1374_v6 }
 0x4c1   :  { %v1714_v52 = vpop.eup %1713 }
 0x4c2   :  { %v1716_v49 = vpop.eup %1715  ;;  %v1508_v20 = vadd.f32 -1.0, %v1714_v52 }
 0x4c3   :  { %v951_v2 = vpop.xlane.xlu0 %950  ;;  %v1510_v40 = vadd.f32 -1.0, %v1716_v49  ;;  %v1718_v31 = vpop.eup %1717 }
 0x4c4   :  { %1721 = vrcp.f32 %v951_v2  ;;  %v1074_v59 = vsel %vm1034_vm0, %v1026_v47, %v1508_v20  ;;  %v1720_v63 = vpop.eup %1719  ;;  %v1525_v55 = vadd.f32 -1.0, %v1718_v31 }
 0x4c5   :  { %1095 = vrot.lane.b32.xlu1 %v1074_v59, %s1765_s7  ;;  %v1076_v41 = vsel %vm1036_vm2, %v1028_v37, %v1510_v40  ;;  %1723 = vrcp.f32 %v2453_v21  ;;  %v1524_v38 = vadd.f32 -1.0, %v1720_v63 }
 0x4c6   :  { %1099 = vrot.lane.b32.xlu0 %v1076_v41, %s1765_s7  ;;  %v1394_v36 = vsel %vm1354_vm3, %v1346_v1, %v1525_v55  ;;  %v1411_v1 = vpop.permute.xlu1 %1410 }
 0x4c7   :  { %v1393_v11 = vsel %vm1353_vm4, %v1345_v28, %v1524_v38 }
 0x4ca   :  { %v1722_v18 = vpop.eup %1721 }
 0x4cb   :  { %v960_v26 = vpop.xlane.xlu0 %959  ;;  %v1024_v43 = vmul.f32 %v1722_v18, %v2467_v60  ;;  %v1724_v42 = vpop.eup %1723 }
 0x4cc   :  { %1725 = vrcp.f32 %v960_v26  ;;  %v1347_v53 = vmul.f32 %v1724_v42, %v1329_v51 }
 0x4cd   :  { %v1040_v7 = vmin.f32 %v1024_v43, 0.0  ;;  %1416 = vrot.lane.b32.xlu1 %v1394_v36, %s1764_s6  ;;  %vm1032_vm7 = vcmp.gt.f32.partialorder %v1024_v43, 0.0 }
 0x4ce   :  { %1414 = vrot.lane.b32.xlu0 %v1393_v11, %s1764_s6  ;;  %v1363_v23 = vmin.f32 %v1347_v53, 0.0  ;;  %vm1355_vm8 = vcmp.gt.f32.partialorder %v1347_v53, 0.0 }
 0x4cf   :  { %v1051_v9 = vmul.f32 1.442695, %v1040_v7 }
 0x4d0   :  { %v1378_v14 = vmul.f32 1.442695, %v1363_v23 }
 0x4d1   :  { %1727 = vpow2.f32 %v1051_v9 }
 0x4d2   :  { %v1726_v21 = vpop.eup %1725 }
 0x4d3   :  { %v1027_v32 = vmul.f32 %v1726_v21, %v2475_v45 }
 0x4d5   :  { %v1043_v60 = vmin.f32 %v1027_v32, 0.0  ;;  %vm1035_vm5 = vcmp.gt.f32.partialorder %v1027_v32, 0.0 }
 0x4d7   :  { %v1728_v15 = vpop.eup %1727  ;;  %v1057_v5 = vmul.f32 1.442695, %v1043_v60 }
 0x4d8   :  { %v1506_v56 = vadd.f32 -1.0, %v1728_v15 }
 0x4d9   :  { %1729 = vpow2.f32 %v1057_v5 }
 0x4da   :  { %v1072_v58 = vsel %vm1032_vm7, %v1024_v43, %v1506_v56  ;;  %1731 = vpow2.f32 %v1378_v14 }
 0x4db   :  { %1091 = vrot.lane.b32.xlu2 %v1072_v58, %s1765_s7 }
 0x4df   :  { %v1730_v34 = vpop.eup %1729 }
 0x4e0   :  { %v1509_v44 = vadd.f32 -1.0, %v1730_v34  ;;  %v1732_v13 = vpop.eup %1731 }
 0x4e1   :  { %v1526_v45 = vadd.f32 -1.0, %v1732_v13 }
 0x4e2   :  { %v1075_v3 = vsel %vm1035_vm5, %v1027_v32, %v1509_v44 }
 0x4e3   :  { %1097 = vrot.lane.b32.xlu2 %v1075_v3, %s1765_s7  ;;  %v1395_v24 = vsel %vm1355_vm8, %v1347_v53, %v1526_v45 }
 0x4eb   :  { %1418 = vrot.lane.b32.xlu2 %v1395_v24, %s1764_s6 }
 0x4f7   :  { %v1086_v8 = vpop.permute.xlu2 %1085 }
 0x4f8   :  { %1110 = vst.msk [vmem:[#allocation2] sm:$0xff] %vm1109_vm9, %v1086_v8 }
 0x4f9   :  { %1429 = vst.msk [vmem:[#allocation2] sm:$0xff] %vm1428_vm10, %v2469_v30 }
 0x528   :  { %v1088_v25 = vpop.permute.xlu0 %1087 }
 0x529   :  { %1111 = vst.msk [vmem:[#allocation2 + $0x8] sm:$0xff] %vm1109_vm9, %v1088_v25 }
 0x52a   :  { %1430 = vst.msk [vmem:[#allocation2 + $0x8] sm:$0xff] %vm1428_vm10, %v2472_v17 }
 0x52f   :  { %v1090_v16 = vpop.permute.xlu1 %1089 }
 0x530   :  { %1112 = vst.msk [vmem:[#allocation2 + $0x10] sm:$0xff] %vm1109_vm9, %v1090_v16  ;;  %v1094_v28 = vpop.permute.xlu0 %1093 }
 0x531   :  { %1431 = vst.msk [vmem:[#allocation2 + $0x10] sm:$0xff] %vm1428_vm10, %v2479_v48 }
 0x532   :  { %1114 = vst.msk [vmem:[#allocation2 + $0x20] sm:$0xff] %vm1109_vm9, %v1094_v28 }
 0x533   :  { %1433 = vst.msk [vmem:[#allocation2 + $0x20] sm:$0xff] %vm1428_vm10, %v1413_v39 }
 0x535   :  { %v1092_v0 = vpop.permute.xlu2 %1091 }
 0x536   :  { %1113 = vst.msk [vmem:[#allocation2 + $0x18] sm:$0xff] %vm1109_vm9, %v1092_v0 }
 0x537   :  { %1432 = vst.msk [vmem:[#allocation2 + $0x18] sm:$0xff] %vm1428_vm10, %v1411_v1  ;;  %v1096_v30 = vpop.permute.xlu1 %1095 }
 0x538   :  { %1115 = vst.msk [vmem:[#allocation2 + $0x28] sm:$0xff] %vm1109_vm9, %v1096_v30  ;;  %v1100_v17 = vpop.permute.xlu0 %1099 }
 0x539   :  { %1117 = vst.msk [vmem:[#allocation2 + $0x38] sm:$0xff] %vm1109_vm9, %v1100_v17 }
 0x53d   :  { %v1098_v19 = vpop.permute.xlu2 %1097 }
 0x53e   :  { %1116 = vst.msk [vmem:[#allocation2 + $0x30] sm:$0xff] %vm1109_vm9, %v1098_v19 }
 0x53f   :  { %v1417_v62 = vpop.permute.xlu1 %1416 }
 0x540   :  { %1435 = vst.msk [vmem:[#allocation2 + $0x30] sm:$0xff] %vm1428_vm10, %v1417_v62  ;;  %v1415_v47 = vpop.permute.xlu0 %1414 }
 0x541   :  { %1434 = vst.msk [vmem:[#allocation2 + $0x28] sm:$0xff] %vm1428_vm10, %v1415_v47 }
 0x545   :  { %v1419_v37 = vpop.permute.xlu2 %1418 }
 0x546   :  { %1436 = vst.msk [vmem:[#allocation2 + $0x38] sm:$0xff] %vm1428_vm10, %v1419_v37 }
 0x547   :  { %1449 = dma.vmem_to_hbm [thread:$0]  %s1442_s9, 1024, %s1444_s12, [#allocation3], %s1767_s13, %s1767_s13, %s1768_s14  }
 0x548   :  { %1757 = dma.done.wait [#allocation3], 1024  }
 0x549   :  { %1758 = vsyncadd [#allocation3], 4294966272 }
 0x54a   :  { %1454 = vsyncpa [#allocation3], 1 }

</bundles_post_ra>
